<compile_context>
chip_gen: v7x
topology: tpu7x:2x2x1
jax: 0.10.0
libtpu: 0.0.40
codegen_flags: <defaults>
</compile_context>

<pallas_src>
import jax
import jax.numpy as jnp
from jax import lax
from jax.experimental import pallas as pl
from jax.experimental.pallas import tpu as pltpu


def _matmul_kernel(w_ref, x_ref, o_ref):
    # w_ref: (TM, Cin) bf16 weight tile (streamed per grid step)
    # x_ref: (Cin, HW) bf16 activations (constant index map -> resident)
    # o_ref: (TM, HW)  f32 output tile.  One MXU matmul per grid step.
    o_ref[...] = jnp.dot(
        w_ref[...],
        x_ref[...],
        preferred_element_type=jnp.float32,
        precision=lax.Precision.DEFAULT,  # single bf16 MXU pass, f32 accumulate
    )


def _pick_tile_m(cout):
    """Tile size along Cout: aim for ~6 grid steps, multiple of 8 sublanes.

    >= 4 steps keeps the weight DMA stream hidden behind compute (no exposed
    prologue beyond the first tile) and gives each v7x TensorCore at least 2
    steps under dimension_semantics=("parallel",); ~6 steps keeps the ~0.35us
    per-step pipeline overhead negligible for this ~5-10us kernel.
    """
    if cout <= 64:
        return cout  # tiny problem: one full-extent block
    tm = pl.cdiv(cout, 6)
    tm = ((tm + 7) // 8) * 8  # round up to a multiple of 8 (sublane aligned)
    return min(tm, cout)


def conv2d_1x1_pallas(x_nchw, weight_oi):
    """1x1 conv, stride 1, no bias.

    x_nchw:    (1, Cin, H, W)  float32
    weight_oi: (Cout, Cin)     float32 (Conv2d weight squeezed over 1x1 kernel)
    returns:   (1, Cout, H, W) float32
    """
    N, Cin, H, W = x_nchw.shape
    assert N == 1, "kernel specialized for batch size 1 (as in the module)"
    Cout = weight_oi.shape[0]
    HW = H * W

    # Free reshape (no transpose): (1, Cin, H, W) -> (Cin, H*W).
    # bf16 cast halves the dominant HBM bytes; DEFAULT MXU precision would
    # truncate f32 operands to bf16 anyway, so numerics are essentially same.
    x2d = x_nchw.reshape(Cin, HW).astype(jnp.bfloat16)
    w2d = weight_oi.astype(jnp.bfloat16)

    tm = _pick_tile_m(Cout)
    grid_m = pl.cdiv(Cout, tm)  # ragged last block is legal (block is 8-aligned)

    out2d = pl.pallas_call(
        _matmul_kernel,
        out_shape=jax.ShapeDtypeStruct((Cout, HW), jnp.float32),
        grid=(grid_m,),
        in_specs=[
            # Weight streamed along Cout; Cin is full extent (exempt from the
            # 128-lane divisibility requirement).
            pl.BlockSpec((tm, Cin), lambda i: (i, 0)),
            # Activations: one full-extent block, constant index map -> DMA'd
            # once and resident across all grid steps (~0.5 MB in bf16).
            pl.BlockSpec((Cin, HW), lambda i: (0, 0)),
        ],
        out_specs=pl.BlockSpec((tm, HW), lambda i: (i, 0)),
        compiler_params=pltpu.CompilerParams(
            dimension_semantics=("parallel",),
        ),
    )(w2d, x2d)

    # Free reshape back: (Cout, H*W) -> (1, Cout, H, W).
    return out2d.reshape(1, Cout, H, W)


if __name__ == "__main__":
    key = jax.random.PRNGKey(0)
    kx, kw = jax.random.split(key)

    N, C, H, W = 1, 1392, 14, 14  # shapes implied by the PyTorch module
    x = jax.random.normal(kx, (N, C, H, W), dtype=jnp.float32)

    # Conv2d(1392, 1392, kernel_size=(1,1), bias=False) weight: (Cout, Cin, 1, 1)
    # squeezed over the 1x1 kernel; deterministic Kaiming-uniform-like init.
    fan_in = C
    bound = 1.0 / (fan_in ** 0.5)
    weight = jax.random.uniform(
        kw, (C, C), minval=-bound, maxval=bound, dtype=jnp.float32
    )

    out = conv2d_1x1_pallas(x, weight)
    out = jax.block_until_ready(out)

    # Reference with the same bf16 operand rounding (f32 accumulation in both).
    ref = jnp.einsum(
        "nchw,oc->nohw",
        x.astype(jnp.bfloat16).astype(jnp.float32),
        weight.astype(jnp.bfloat16).astype(jnp.float32),
        precision=lax.Precision.HIGHEST,
    )
    assert out.shape == (N, C, H, W)
    assert jnp.allclose(out, ref, atol=2e-3, rtol=2e-3)

    print("KERNEL_OK")
</pallas_src>

<mosaic_0001>
module attributes {stable_mosaic.version = 11 : i64} {
  func.func @_matmul_kernel(%arg0: i32, %arg1: memref<232x1392xbf16, #tpu.memory_space<vmem>>, %arg2: memref<1392x196xbf16, #tpu.memory_space<vmem>>, %arg3: memref<232x196xf32, #tpu.memory_space<vmem>>) attributes {dimension_semantics = [#tpu.dimension_semantics<parallel>], iteration_bounds = array<i64: 6>, scalar_prefetch = 0 : i64, scratch_operands = 0 : i64, tpu.core_type = #tpu.core_type<tc>, window_params = [{transform_indices = @transform_0, window_bounds = array<i64: 232, 1392>}, {pipeline_mode = #tpu.pipeline_mode<synchronous>, transform_indices = @transform_1, window_bounds = array<i64: 1392, 196>}, {transform_indices = @transform_2, window_bounds = array<i64: 232, 196>}]} {
    %c0 = arith.constant 0 : index
    %c0_0 = arith.constant 0 : index
    %0 = vector.load %arg1[%c0, %c0_0] : memref<232x1392xbf16, #tpu.memory_space<vmem>>, vector<232x1392xbf16>
    %c0_1 = arith.constant 0 : index
    %c0_2 = arith.constant 0 : index
    %1 = vector.load %arg2[%c0_1, %c0_2] : memref<1392x196xbf16, #tpu.memory_space<vmem>>, vector<1392x196xbf16>
    %cst = arith.constant dense<0.000000e+00> : vector<232x196xf32>
    %2 = tpu.matmul %0, %1, %cst {dimension_numbers = #tpu.dot_dimension_numbers<[1], [0], [0], [1], [0, 0, 1, 1], [], []>} : vector<232x1392xbf16>, vector<1392x196xbf16>, vector<232x196xf32> -> vector<232x196xf32>
    %c0_3 = arith.constant 0 : index
    %c0_4 = arith.constant 0 : index
    %3 = vector.load %arg3[%c0_3, %c0_4] : memref<232x196xf32, #tpu.memory_space<vmem>>, vector<232x196xf32>
    tpu.vector_store %arg3[%c0_3, %c0_4], %2 {strides = array<i32>} : memref<232x196xf32, #tpu.memory_space<vmem>>, vector<232x196xf32>,
    return
  }
  func.func @transform_0(%arg0: i32) -> (i32, i32) {
    %c0_i32 = arith.constant 0 : i32
    %c0_i32_0 = arith.constant 0 : i32
    return %arg0, %c0_i32 : i32, i32
  }
  func.func @transform_1(%arg0: i32) -> (i32, i32) {
    %c0_i32 = arith.constant 0 : i32
    %c0_i32_0 = arith.constant 0 : i32
    %c0_i32_1 = arith.constant 0 : i32
    return %c0_i32, %c0_i32_0 : i32, i32
  }
  func.func @transform_2(%arg0: i32) -> (i32, i32) {
    %c0_i32 = arith.constant 0 : i32
    %c0_i32_0 = arith.constant 0 : i32
    return %arg0, %c0_i32 : i32, i32
  }
}

</mosaic_0001>

<bundles_post_ra>
// kernel: tpu_custom_call.1
= control target key start
LH: loop header
LB: loop body
LE: loop exit
PB: predicated region body
PF: predicated region fallthrough
CT: control target
= control target key end

     0   :  { %7 = vsyncpa [#allocation3], 0  ;;  %s5654_s0 = inlined_call_operand.hbm [shape: bf16[1392,1392], index: 0, kind: input, shape index: {}]   ;;  %s5655_s1 = inlined_call_operand.vmem [shape: bf16[1392,196], index: 1, kind: input, shape index: {}]   ;;  %s5656_s2 = inlined_call_operand.vmem [shape: f32[1392,196], index: 2, kind: output, shape index: {}]  }
   0x1   :  { %9 = vsyncpa [#allocation3 + $0x1], 0  ;;  %s4746_s9 = smov 0   ;;  %s4748_s10 = smov 0  }
   0x2   :  { %s4750_s11 = smov 0   ;;  %s4752_s12 = smov 0  }
   0x3 LB: > { %s3456_s13 = sadd.s32 4294967295, %s4725_s12   ;;  %s4766_s14 = sadd.s32 1, %s4725_s12   ;;  %s4725_s12 = sphi %s4752_s12, %s5662_s12   ;;  %s4721_s11 = sphi %s4750_s11, %s5661_s11   ;;  %s4717_s10 = sphi %s4748_s10, %s5660_s10   ;;  %s4713_s9 = sphi %s4746_s9, %s5659_s9  }
   0x4   : > { %s19_s15 = ssub.s32 %s4725_s12, %s4766_s14  ;;  %s22_s16 = sadd.s32 1, %s4721_s11 }
   0x5   : > { %p20_p0 = scmp.eq.s32.totalorder %s19_s15, 0  ;;  %p29_p1 = scmp.ne.s32.totalorder %s4721_s11, %s4717_s10 }
   0x6   : > { %p30_p2 = scmp.eq.s32.totalorder %s4725_s12, 0  ;;  %p35_p3 = scmp.ne.s32.totalorder %s4717_s10, %s4713_s9 }
   0x7   : > { %s4776_s17 = scalar_select %p20_p0, %s4721_s11, %s22_s16  }
   0x8   : > { %p31_p4 = por %p30_p2, %p29_p1  ;;  %p36_p5 = scmp.eq.s32.totalorder %s3456_s13, 0 }
   0x9   : > { %p4128_p6 = scmp.lt.s32.totalorder %s4725_s12, 6  ;;  %s109_s19 = sand.u32 1, %s4721_s11  }
   0xa   : > { %p4781_p7 = por %p36_p5, %p35_p3  ;;  %s4119_s20 = smul.u32 1276, %s109_s19 }
   0xb   : > { %p4786_p8 = pnand %p4128_p6, %p31_p4  ;;  %s4129_s22 = smul.u32 20416, %s4725_s12 }
   0xc   : > { %s113_s23 = scalar_lea.vmem [#allocation2], %s4119_s20  ;;  %s4798_s28 = scalar_lea.sflag [#allocation3], %s109_s19 }
   0xd   : > { %s121_s24 = sshll.u32 %s113_s23, 4  ;;  %s4794_s27 = scalar_lea.hbm %s5654_s0, %s4129_s22  ;;  %s4796_s24 = int_to_ptr.vmem [resolvable:$true] %s121_s24 }
   0xe   : > { %s4661_s29 = scalar_lea.hbm %s4794_s27, 20416  ;;  %p4663_p10 = pneg %p4786_p8 }
   0xf   : > { %p4662_p9 = scmp.ne.s32.totalorder %s4794_s27, %s4661_s29  ;;  %s4666_s4 = scalar_lea.hbm %s5654_s0, 122496 }
  0x10   : > { %p4667_p13 = scmp.lt.u32.totalorder %s4794_s27, %s5654_s0  ;;  %p4668_p0 = scmp.lt.u32.totalorder %s4666_s4, %s4661_s29 }
  0x11   : > { %p4664_p11 = pnand %p4663_p10, %p4662_p9  ;;  %p4670_p2 = scmp.lt.u32.totalorder %s4661_s29, %s4794_s27 }
  0x12   : > { %p4669_p1 = por %p4668_p0, %p4667_p13 }
  0x13   : > { %p4665_p12 = pneg %p4664_p11 }
  0x14   : > { %p4671_p3 = por %p4670_p2, %p4669_p1 }
  0x16   : > { %p4672_p4 = pnand %p4671_p3, %p4665_p12 }
  0x18   : > { %4675 = shalt.err (!%p4672_p4)
}
  0x19   : > { %s4676_s7 = scalar_lea.vmem %s4796_s24, 20416  ;;  %s4727_s8 = smov [#allocation2]  }
  0x1a   : > { %p4677_p5 = scmp.ne.s32.totalorder %s4796_s24, %s4676_s7  ;;  %s4681_s9 = sshll.u32 %s4727_s8, 4  ;;  %s4682_s9 = int_to_ptr.vmem [resolvable:$false] %s4681_s9 }
  0x1b   : > { %s4683_s15 = scalar_lea.vmem %s4682_s9, 40832  ;;  %p4684_p11 = scmp.lt.s32.totalorder %s4796_s24, %s4682_s9 }
  0x1c   : > { %p4679_p6 = pnand %p4677_p5, %p4663_p10  ;;  %p4685_p13 = scmp.lt.s32.totalorder %s4683_s15, %s4676_s7 }
  0x1e   : > { %p4680_p9 = pneg %p4679_p6  ;;  %p4686_p0 = por %p4685_p13, %p4684_p11 }
  0x20   : > { %p4687_p1 = pnand %p4686_p0, %p4680_p9 }
  0x22   : > { %4690 = shalt.err (!%p4687_p1)
}
  0x23   : > { %s4728_s16 = smov 704   ;;  %s4729_s19 = smov 44  }
  0x24   : > { %4127 = dma.hbm_to_vmem [thread:$0]  (!%p4786_p8), %s4794_s27, 20416, %s4796_s24, %s4798_s28, %s4728_s16, %s4728_s16, %s4729_s19  }
  0x25   : > { %p3461_p10 = scmp.ge.s32.totalorder %s4725_s12, 1  ;;  %p129_p12 = scmp.lt.s32.totalorder %s4725_s12, 7 }
  0x27   : > { %p130_p2 = pnand %p3461_p10, %p129_p12 }
  0x28   : > { %s135_s20 = sand.u32 (!%p130_p2), 1, %s4717_s10  }
  0x29   : > { %133 = sbr.rel (%p130_p2) target bundleno = 683 (0x2ab), region = 28  ;;  %s136_s23 = scalar_lea.sflag (!%p130_p2), [#allocation3], %s135_s20 }
  0x2a   : > { %s4121_s22 = smul.u32 (!%p130_p2), 1276, %s135_s20 }
  0x2c   : > { %s4829_s25 = scalar_lea.vmem (!%p130_p2), [#allocation2], %s4121_s22 }
  0x30   : > { %4708 = dma.done.wait (%p4781_p7), %s136_s23, 20416  }
  0x31   : > { %4710 = vsyncadd (%p4781_p7), %s136_s23, 4294946880  ;;  %v4165_v0 = vld [vmem:[%s5655_s1 + $0x4] ss:$8 sps:$4 sm:$0xff]   ;;  %v4169_v2 = vld [vmem:[%s5655_s1] ss:$8 sps:$4 sm:$0xff]   ;;  %vm2196_vm0 = vcmask 916480  }
  0x32   : > { %v4167_v1 = vld [vmem:[%s5655_s1 + $0x304] ss:$8 sps:$4 sm:$0xff]   ;;  %2242 = vmatprep.subr.bf16.mxu1 %v4165_v0  ;;  %v4170_v3 = vld [vmem:[%s5655_s1 + $0x300] ss:$8 sps:$4 sm:$0xff]   ;;  %v4171_v4 = vld [vmem:[%s5655_s1 + $0x14] ss:$8 sps:$4 sm:$0xff]  }
  0x33   : > { %2785 = vmatprep.subr.bf16.mxu0 %v4167_v1  ;;  %2243 = vmatpush1.bf16.msra.mxu1 %v4169_v2  ;;  %v4173_v5 = vld [vmem:[%s5655_s1 + $0x314] ss:$8 sps:$4 sm:$0xff]   ;;  %v4175_v6 = vld [vmem:[%s5655_s1 + $0x10] ss:$8 sps:$4 sm:$0xff]   ;;  %v4177_v8 = vld [vmem:[%s5655_s1 + $0x24] ss:$8 sps:$4 sm:$0xff]  }
  0x34   : > { %2786 = vmatpush1.bf16.msra.mxu0 %v4170_v3  ;;  %2244 = vmatprep.subr.bf16.mxu1 %v4171_v4  ;;  %v4176_v7 = vld [vmem:[%s5655_s1 + $0x310] ss:$8 sps:$4 sm:$0xff]   ;;  %v4179_v9 = vld [vmem:[%s5655_s1 + $0x324] ss:$8 sps:$4 sm:$0xff]   ;;  %v4181_v10 = vld [vmem:[%s5655_s1 + $0x20] ss:$8 sps:$4 sm:$0xff]  }
  0x35   : > { %2787 = vmatprep.subr.bf16.mxu0 %v4173_v5  ;;  %v4182_v11 = vld [vmem:[%s5655_s1 + $0x320] ss:$8 sps:$4 sm:$0xff]   ;;  %v4183_v12 = vld [vmem:[%s5655_s1 + $0x34] ss:$8 sps:$4 sm:$0xff]   ;;  %v4187_v14 = vld [vmem:[%s5655_s1 + $0x30] ss:$8 sps:$4 sm:$0xff]  }
  0x36   : > { %v4185_v13 = vld [vmem:[%s5655_s1 + $0x334] ss:$8 sps:$4 sm:$0xff]   ;;  %v4188_v15 = vld [vmem:[%s5655_s1 + $0x330] ss:$8 sps:$4 sm:$0xff]   ;;  %v4189_v16 = vld [vmem:[%s5655_s1 + $0x44] ss:$8 sps:$4 sm:$0xff]  }
  0x37   : > { %2245 = vmatpush1.bf16.msra.mxu1 %v4175_v6  ;;  %v4191_v17 = vld [vmem:[%s5655_s1 + $0x344] ss:$8 sps:$4 sm:$0xff]   ;;  %v4193_v18 = vld [vmem:[%s5655_s1 + $0x40] ss:$8 sps:$4 sm:$0xff]   ;;  %v4195_v20 = vld [vmem:[%s5655_s1 + $0x54] ss:$8 sps:$4 sm:$0xff]  }
  0x38   : > { %2788 = vmatpush1.bf16.msra.mxu0 %v4176_v7  ;;  %2246 = vmatprep.subr.bf16.mxu1 %v4177_v8  ;;  %v4194_v19 = vld [vmem:[%s5655_s1 + $0x340] ss:$8 sps:$4 sm:$0xff]   ;;  %v4197_v21 = vld [vmem:[%s5655_s1 + $0x354] ss:$8 sps:$4 sm:$0xff]   ;;  %v4199_v22 = vld [vmem:[%s5655_s1 + $0x50] ss:$8 sps:$4 sm:$0xff]  }
  0x39   : > { %2789 = vmatprep.subr.bf16.mxu0 %v4179_v9  ;;  %v4200_v23 = vld [vmem:[%s5655_s1 + $0x350] ss:$8 sps:$4 sm:$0xff]   ;;  %v4201_v24 = vld [vmem:[%s5655_s1 + $0x64] ss:$8 sps:$4 sm:$0xff]   ;;  %v4205_v26 = vld [vmem:[%s5655_s1 + $0x60] ss:$8 sps:$4 sm:$0xff]  }
  0x3a   : > { %v4203_v25 = vld [vmem:[%s5655_s1 + $0x364] ss:$8 sps:$4 sm:$0xff]   ;;  %v4206_v27 = vld [vmem:[%s5655_s1 + $0x360] ss:$8 sps:$4 sm:$0xff]   ;;  %v4207_v28 = vld [vmem:[%s5655_s1 + $0x74] ss:$8 sps:$4 sm:$0xff]  }
  0x3b   : > { %2247 = vmatpush1.bf16.msra.mxu1 %v4181_v10  ;;  %v4209_v29 = vld [vmem:[%s5655_s1 + $0x374] ss:$8 sps:$4 sm:$0xff]   ;;  %v4211_v30 = vld [vmem:[%s5655_s1 + $0x70] ss:$8 sps:$4 sm:$0xff]   ;;  %v4213_v32 = vld [vmem:[%s5655_s1 + $0x84] ss:$8 sps:$4 sm:$0xff]  }
  0x3c   : > { %2790 = vmatpush1.bf16.msra.mxu0 %v4182_v11  ;;  %2248 = vmatprep.subr.bf16.mxu1 %v4183_v12  ;;  %v4212_v31 = vld [vmem:[%s5655_s1 + $0x370] ss:$8 sps:$4 sm:$0xff]   ;;  %v4215_v33 = vld [vmem:[%s5655_s1 + $0x384] ss:$8 sps:$4 sm:$0xff]   ;;  %v4217_v34 = vld [vmem:[%s5655_s1 + $0x80] ss:$8 sps:$4 sm:$0xff]  }
  0x3d   : > { %2791 = vmatprep.subr.bf16.mxu0 %v4185_v13  ;;  %v4218_v35 = vld [vmem:[%s5655_s1 + $0x380] ss:$8 sps:$4 sm:$0xff]   ;;  %v4219_v36 = vld [vmem:[%s5655_s1 + $0x94] ss:$8 sps:$4 sm:$0xff]   ;;  %v4223_v38 = vld [vmem:[%s5655_s1 + $0x90] ss:$8 sps:$4 sm:$0xff]  }
  0x3e   : > { %v4221_v37 = vld [vmem:[%s5655_s1 + $0x394] ss:$8 sps:$4 sm:$0xff]   ;;  %v4224_v39 = vld [vmem:[%s5655_s1 + $0x390] ss:$8 sps:$4 sm:$0xff]   ;;  %v4225_v40 = vld [vmem:[%s5655_s1 + $0xa4] ss:$8 sps:$4 sm:$0xff]  }
  0x3f   : > { %2249 = vmatpush1.bf16.msra.mxu1 %v4187_v14  ;;  %v4227_v41 = vld [vmem:[%s5655_s1 + $0x3a4] ss:$8 sps:$4 sm:$0xff]   ;;  %v4229_v42 = vld [vmem:[%s5655_s1 + $0xa0] ss:$8 sps:$4 sm:$0xff]   ;;  %v4231_v44 = vld [vmem:[%s5655_s1 + $0xb4] ss:$8 sps:$4 sm:$0xff]  }
  0x40   : > { %2792 = vmatpush1.bf16.msra.mxu0 %v4188_v15  ;;  %2250 = vmatprep.subr.bf16.mxu1 %v4189_v16  ;;  %v4230_v43 = vld [vmem:[%s5655_s1 + $0x3a0] ss:$8 sps:$4 sm:$0xff]   ;;  %v4233_v45 = vld [vmem:[%s5655_s1 + $0x3b4] ss:$8 sps:$4 sm:$0xff]   ;;  %v4235_v46 = vld [vmem:[%s5655_s1 + $0xb0] ss:$8 sps:$4 sm:$0xff]  }
  0x41   : > { %2793 = vmatprep.subr.bf16.mxu0 %v4191_v17  ;;  %v4236_v47 = vld [vmem:[%s5655_s1 + $0x3b0] ss:$8 sps:$4 sm:$0xff]   ;;  %v4237_v48 = vld [vmem:[%s5655_s1 + $0xc4] ss:$8 sps:$4 sm:$0xff]   ;;  %v4241_v52 = vld [vmem:[%s5655_s1 + $0xc0] ss:$8 sps:$4 sm:$0xff]  }
  0x42   : > { %v4263_v49 = vld [vmem:[%s4829_s25 + $0x4] ss:$44 sps:$4 sm:$0xff]   ;;  %v4266_v51 = vld [vmem:[%s4829_s25 + $0x1c] ss:$44 sps:$4 sm:$0xff]   ;;  %v4261_v4 = vld [vmem:[%s4829_s25] ss:$44 sps:$4 sm:$0xff]  }
  0x43   : > { %2251 = vmatpush1.bf16.msra.mxu1 %v4193_v18  ;;  %v4239_v50 = vld [vmem:[%s5655_s1 + $0x3c4] ss:$8 sps:$4 sm:$0xff]   ;;  %2274 = vmatprep.mubr.bf16.mxu1 %v4263_v49  ;;  %v4242_v53 = vld [vmem:[%s5655_s1 + $0x3c0] ss:$8 sps:$4 sm:$0xff]   ;;  %v4243_v54 = vld [vmem:[%s5655_s1 + $0xd4] ss:$8 sps:$4 sm:$0xff]  }
  0x44   : > { %2794 = vmatpush1.bf16.msra.mxu0 %v4194_v19  ;;  %2252 = vmatprep.subr.bf16.mxu1 %v4195_v20  ;;  %v4245_v55 = vld [vmem:[%s5655_s1 + $0x3d4] ss:$8 sps:$4 sm:$0xff]   ;;  %v4247_v56 = vld [vmem:[%s5655_s1 + $0xd0] ss:$8 sps:$4 sm:$0xff]   ;;  %v4249_v58 = vld [vmem:[%s5655_s1 + $0xe4] ss:$8 sps:$4 sm:$0xff]  }
  0x45   : > { %2795 = vmatprep.subr.bf16.mxu0 %v4197_v21  ;;  %2817 = vmatprep.mubr.bf16.mxu0 %v4266_v51  ;;  %v4248_v57 = vld [vmem:[%s5655_s1 + $0x3d0] ss:$8 sps:$4 sm:$0xff]   ;;  %v4251_v59 = vld [vmem:[%s5655_s1 + $0x3e4] ss:$8 sps:$4 sm:$0xff]   ;;  %v4253_v60 = vld [vmem:[%s5655_s1 + $0xe0] ss:$8 sps:$4 sm:$0xff]  }
  0x46   : > { %v4254_v61 = vld [vmem:[%s5655_s1 + $0x3e0] ss:$8 sps:$4 sm:$0xff]   ;;  %v4255_v62 = vld [vmem:[%s5655_s1 + $0xf4] ss:$8 sps:$4 sm:$0xff]   ;;  %v4259_v0 = vld [vmem:[%s5655_s1 + $0xf0] ss:$8 sps:$4 sm:$0xff]  }
  0x47   : > { %2253 = vmatpush1.bf16.msra.mxu1 %v4199_v22  ;;  %v4257_v63 = vld [vmem:[%s5655_s1 + $0x3f4] ss:$8 sps:$4 sm:$0xff]   ;;  %v4260_v1 = vld [vmem:[%s5655_s1 + $0x3f0] ss:$8 sps:$4 sm:$0xff]   ;;  %v4269_v2 = vld [vmem:[%s5655_s1 + $0x104] ss:$8 sps:$4 sm:$0xff]  }
  0x48   : > { %2796 = vmatpush1.bf16.msra.mxu0 %v4200_v23  ;;  %2254 = vmatprep.subr.bf16.mxu1 %v4201_v24  ;;  %v4272_v3 = vld [vmem:[%s5655_s1 + $0x404] ss:$8 sps:$4 sm:$0xff]   ;;  %v4267_v6 = vld [vmem:[%s5655_s1 + $0x100] ss:$8 sps:$4 sm:$0xff]   ;;  %v4280_v10 = vld [vmem:[%s5655_s1 + $0x114] ss:$8 sps:$4 sm:$0xff]  }
  0x49   : > { %2797 = vmatprep.subr.bf16.mxu0 %v4203_v25  ;;  %v4264_v5 = vld [vmem:[%s4829_s25 + $0x18] ss:$44 sps:$4 sm:$0xff]   ;;  %v4273_v8 = vld [vmem:[%s4829_s25 + $0x5c] ss:$44 sps:$4 sm:$0xff]   ;;  %v4275_v9 = vld [vmem:[%s4829_s25 + $0x74] ss:$44 sps:$4 sm:$0xff]  }
  0x4a   : > { %v4270_v7 = vld [vmem:[%s5655_s1 + $0x400] ss:$8 sps:$4 sm:$0xff]   ;;  %v4284_v11 = vld [vmem:[%s5655_s1 + $0x414] ss:$8 sps:$4 sm:$0xff]   ;;  %v4278_v12 = vld [vmem:[%s5655_s1 + $0x110] ss:$8 sps:$4 sm:$0xff]  }
  0x4b   : > { %2255 = vmatpush1.bf16.msra.mxu1 %v4205_v26  ;;  %v4282_v13 = vld [vmem:[%s5655_s1 + $0x410] ss:$8 sps:$4 sm:$0xff]   ;;  %v4289_v14 = vld [vmem:[%s5655_s1 + $0x124] ss:$8 sps:$4 sm:$0xff]   ;;  %v4287_v19 = vld [vmem:[%s5655_s1 + $0x120] ss:$8 sps:$4 sm:$0xff]  }
  0x4c   : > { %2798 = vmatpush1.bf16.msra.mxu0 %v4206_v27  ;;  %2256 = vmatprep.subr.bf16.mxu1 %v4207_v28  ;;  %v4294_v15 = vld [vmem:[%s5655_s1 + $0x424] ss:$8 sps:$4 sm:$0xff]   ;;  %v4285_v18 = vld [vmem:[%s4829_s25 + $0xb4] ss:$44 sps:$4 sm:$0xff]   ;;  %s162_s7 = smul.u32 29, %s3456_s13  ;;  %vm3329_vm1 = vcmask 556032  }
  0x4d   : > { %2799 = vmatprep.subr.bf16.mxu0 %v4209_v29  ;;  %v4277_v16 = vld [vmem:[%s4829_s25 + $0x58] ss:$44 sps:$4 sm:$0xff]   ;;  %v4281_v17 = vld [vmem:[%s4829_s25 + $0x70] ss:$44 sps:$4 sm:$0xff]   ;;  %v4296_v29 = vld [vmem:[%s4829_s25 + $0xc8] ss:$44 sps:$4 sm:$0xff]  }
  0x4e   : > { %v4290_v20 = vld [vmem:[%s4829_s25 + $0xcc] ss:$44 sps:$4 sm:$0xff]   ;;  %v4295_v26 = vld [vmem:[%s4829_s25 + $0xb0] ss:$44 sps:$4 sm:$0xff]   ;;  %p163_p7 = scmp.lt.s32.totalorder %s162_s7, 173 }
  0x4f   : > { %2257 = vmatpush1.bf16.msra.mxu1 %v4211_v30  ;;  %v4292_v21 = vld [vmem:[%s5655_s1 + $0x420] ss:$8 sps:$4 sm:$0xff]   ;;  %v4301_v22 = vld [vmem:[%s5655_s1 + $0x134] ss:$8 sps:$4 sm:$0xff]   ;;  %v4299_v24 = vld [vmem:[%s5655_s1 + $0x130] ss:$8 sps:$4 sm:$0xff]  }
  0x50   : > { %2800 = vmatpush1.bf16.msra.mxu0 %v4212_v31  ;;  %2258 = vmatprep.subr.bf16.mxu1 %v4213_v32  ;;  %v4306_v23 = vld [vmem:[%s5655_s1 + $0x434] ss:$8 sps:$4 sm:$0xff]   ;;  %v4304_v25 = vld [vmem:[%s5655_s1 + $0x430] ss:$8 sps:$4 sm:$0xff]   ;;  %v4311_v27 = vld [vmem:[%s5655_s1 + $0x144] ss:$8 sps:$4 sm:$0xff]  }
  0x51   : > { %2801 = vmatprep.subr.bf16.mxu0 %v4215_v33  ;;  %v4314_v28 = vld [vmem:[%s5655_s1 + $0x444] ss:$8 sps:$4 sm:$0xff]   ;;  %v4309_v32 = vld [vmem:[%s5655_s1 + $0x140] ss:$8 sps:$4 sm:$0xff]   ;;  %v4348_v49 = vld [vmem:[%s5655_s1 + $0x470] ss:$8 sps:$4 sm:$0xff]  }
  0x52   : > { %v4297_v30 = vld [vmem:[%s4829_s25 + $0x10c] ss:$44 sps:$4 sm:$0xff]   ;;  %v4302_v31 = vld [vmem:[%s4829_s25 + $0x124] ss:$44 sps:$4 sm:$0xff]   ;;  %s5664_s7 = smov (!%p163_p7, %s162_s7), 173 }
  0x53   : > { %2259 = vmatpush1.bf16.msra.mxu1 %v4217_v34  ;;  %v4312_v33 = vld [vmem:[%s5655_s1 + $0x440] ss:$8 sps:$4 sm:$0xff]   ;;  %v4323_v34 = vld [vmem:[%s5655_s1 + $0x154] ss:$8 sps:$4 sm:$0xff]   ;;  %v4359_v51 = vld [vmem:[%s5655_s1 + $0x184] ss:$8 sps:$4 sm:$0xff]  }
  0x54   : > { %2802 = vmatpush1.bf16.msra.mxu0 %v4218_v35  ;;  %2260 = vmatprep.subr.bf16.mxu1 %v4219_v36  ;;  %v4326_v35 = vld [vmem:[%s5655_s1 + $0x454] ss:$8 sps:$4 sm:$0xff]   ;;  %v4321_v36 = vld [vmem:[%s5655_s1 + $0x150] ss:$8 sps:$4 sm:$0xff]   ;;  %s3820_s8 = sshll.u32 %s5664_s7, 4 }
  0x55   : > { %2803 = vmatprep.subr.bf16.mxu0 %v4221_v37  ;;  %v4307_v37 = vld [vmem:[%s4829_s25 + $0x108] ss:$44 sps:$4 sm:$0xff]   ;;  %s5552_s16 = scalar_lea.vmem %s5656_s2, %s3820_s8 }
  0x57   : > { %2261 = vmatpush1.bf16.msra.mxu1 %v4223_v38  ;;  %v4308_v38 = vld [vmem:[%s4829_s25 + $0x120] ss:$44 sps:$4 sm:$0xff]  }
  0x58   : > { %2804 = vmatpush1.bf16.msra.mxu0 %v4224_v39  ;;  %2262 = vmatprep.subr.bf16.mxu1 %v4225_v40  ;;  %v4324_v39 = vld [vmem:[%s5655_s1 + $0x450] ss:$8 sps:$4 sm:$0xff]   ;;  %v4335_v40 = vld [vmem:[%s5655_s1 + $0x164] ss:$8 sps:$4 sm:$0xff]  }
  0x59   : > { %2805 = vmatprep.subr.bf16.mxu0 %v4227_v41  ;;  %v4338_v41 = vld [vmem:[%s5655_s1 + $0x464] ss:$8 sps:$4 sm:$0xff]  }
  0x5b   : > { %2263 = vmatpush1.bf16.msra.mxu1 %v4229_v42  ;;  %v4315_v42 = vld [vmem:[%s4829_s25 + $0x164] ss:$44 sps:$4 sm:$0xff]  }
  0x5c   : > { %2806 = vmatpush1.bf16.msra.mxu0 %v4230_v43  ;;  %2264 = vmatprep.subr.bf16.mxu1 %v4231_v44  ;;  %v4317_v43 = vld [vmem:[%s4829_s25 + $0x17c] ss:$44 sps:$4 sm:$0xff]  }
  0x5d   : > { %2807 = vmatprep.subr.bf16.mxu0 %v4233_v45  ;;  %v4333_v44 = vld [vmem:[%s5655_s1 + $0x160] ss:$8 sps:$4 sm:$0xff]  }
  0x5e   : > { %v4336_v45 = vld [vmem:[%s5655_s1 + $0x460] ss:$8 sps:$4 sm:$0xff]  }
  0x5f   : > { %2265 = vmatpush1.bf16.msra.mxu1 %v4235_v46  ;;  %v4347_v46 = vld [vmem:[%s5655_s1 + $0x174] ss:$8 sps:$4 sm:$0xff]  }
  0x60   : > { %2808 = vmatpush1.bf16.msra.mxu0 %v4236_v47  ;;  %2266 = vmatprep.subr.bf16.mxu1 %v4237_v48  ;;  %v4350_v47 = vld [vmem:[%s5655_s1 + $0x474] ss:$8 sps:$4 sm:$0xff]   ;;  %v4345_v48 = vld [vmem:[%s5655_s1 + $0x170] ss:$8 sps:$4 sm:$0xff]  }
  0x61   : > { %2809 = vmatprep.subr.bf16.mxu0 %v4239_v50  ;;  %v4319_v50 = vld [vmem:[%s4829_s25 + $0x160] ss:$44 sps:$4 sm:$0xff]  }
  0x63   : > { %2267 = vmatpush1.bf16.msra.mxu1 %v4241_v52  ;;  %v4362_v52 = vld [vmem:[%s5655_s1 + $0x484] ss:$8 sps:$4 sm:$0xff]  }
  0x64   : > { %2810 = vmatpush1.bf16.msra.mxu0 %v4242_v53  ;;  %2268 = vmatprep.subr.bf16.mxu1 %v4243_v54  ;;  %v4320_v53 = vld [vmem:[%s4829_s25 + $0x178] ss:$44 sps:$4 sm:$0xff]   ;;  %v4327_v54 = vld [vmem:[%s4829_s25 + $0x1bc] ss:$44 sps:$4 sm:$0xff]  }
  0x65   : > { %2811 = vmatprep.subr.bf16.mxu0 %v4245_v55  ;;  %v4329_v55 = vld [vmem:[%s4829_s25 + $0x1d4] ss:$44 sps:$4 sm:$0xff]  }
  0x67   : > { %2269 = vmatpush1.bf16.msra.mxu1 %v4247_v56  ;;  %v4357_v56 = vld [vmem:[%s5655_s1 + $0x180] ss:$8 sps:$4 sm:$0xff]  }
  0x68   : > { %2812 = vmatpush1.bf16.msra.mxu0 %v4248_v57  ;;  %2270 = vmatprep.subr.bf16.mxu1 %v4249_v58  ;;  %v4360_v57 = vld [vmem:[%s5655_s1 + $0x480] ss:$8 sps:$4 sm:$0xff]   ;;  %v4371_v58 = vld [vmem:[%s5655_s1 + $0x194] ss:$8 sps:$4 sm:$0xff]  }
  0x69   : > { %2813 = vmatprep.subr.bf16.mxu0 %v4251_v59  ;;  %v4374_v59 = vld [vmem:[%s5655_s1 + $0x494] ss:$8 sps:$4 sm:$0xff]  }
  0x6b   : > { %2271 = vmatpush1.bf16.msra.mxu1 %v4253_v60  ;;  %v4369_v60 = vld [vmem:[%s5655_s1 + $0x190] ss:$8 sps:$4 sm:$0xff]  }
  0x6c   : > { %2814 = vmatpush1.bf16.msra.mxu0 %v4254_v61  ;;  %2272 = vmatprep.subr.bf16.mxu1 %v4255_v62  ;;  %v4331_v61 = vld [vmem:[%s4829_s25 + $0x1b8] ss:$44 sps:$4 sm:$0xff]   ;;  %v4332_v62 = vld [vmem:[%s4829_s25 + $0x1d0] ss:$44 sps:$4 sm:$0xff]  }
  0x6d   : > { %2815 = vmatprep.subr.bf16.mxu0 %v4257_v63  ;;  %v4372_v63 = vld [vmem:[%s5655_s1 + $0x490] ss:$8 sps:$4 sm:$0xff]  }
  0x6f   : > { %2273 = vmatpush1.bf16.msra.mxu1 %v4259_v0  ;;  %v4383_v0 = vld [vmem:[%s5655_s1 + $0x1a4] ss:$8 sps:$4 sm:$0xff]  }
  0x70   : > { %2816 = vmatpush1.bf16.msra.mxu0 %v4260_v1  ;;  %2423 = vmatprep.subr.bf16.mxu1 %v4269_v2  ;;  %v4386_v1 = vld [vmem:[%s5655_s1 + $0x4a4] ss:$8 sps:$4 sm:$0xff]   ;;  %v4339_v2 = vld [vmem:[%s4829_s25 + $0x214] ss:$44 sps:$4 sm:$0xff]  }
  0x71   : > { %2966 = vmatprep.subr.bf16.mxu0 %v4272_v3  ;;  %v4341_v3 = vld [vmem:[%s4829_s25 + $0x22c] ss:$44 sps:$4 sm:$0xff]  }
  0x72   : > { %2275 = vmatmul.mubr.bf16.vlgmr.msra.gmra.mrb[0].mxu1 %v4261_v4  ;;  %v4381_v4 = vld [vmem:[%s5655_s1 + $0x1a0] ss:$8 sps:$4 sm:$0xff]  }
  0x73   : > { %2818 = vmatmul.mubr.bf16.vlgmr.msra.gmra.mrb[0].mxu0 %v4264_v5  ;;  %2424 = vmatpush1.bf16.msra.mxu1 %v4267_v6  ;;  %v4384_v5 = vld [vmem:[%s5655_s1 + $0x4a0] ss:$8 sps:$4 sm:$0xff]   ;;  %v4395_v6 = vld [vmem:[%s5655_s1 + $0x1b4] ss:$8 sps:$4 sm:$0xff]  }
  0x74   : > { %2967 = vmatpush1.bf16.msra.mxu0 %v4270_v7  ;;  %2284 = vmatprep.mubr.bf16.mxu1 %v4273_v8  ;;  %v4398_v7 = vld [vmem:[%s5655_s1 + $0x4b4] ss:$8 sps:$4 sm:$0xff]   ;;  %v4393_v8 = vld [vmem:[%s5655_s1 + $0x1b0] ss:$8 sps:$4 sm:$0xff]  }
  0x75   : > { %2827 = vmatprep.mubr.bf16.mxu0 %v4275_v9  ;;  %2425 = vmatprep.subr.bf16.mxu1 %v4280_v10  ;;  %v4396_v9 = vld [vmem:[%s5655_s1 + $0x4b0] ss:$8 sps:$4 sm:$0xff]  }
  0x76   : > { %2968 = vmatprep.subr.bf16.mxu0 %v4284_v11  ;;  %v4343_v10 = vld [vmem:[%s4829_s25 + $0x210] ss:$44 sps:$4 sm:$0xff]  }
  0x77   : > { %2426 = vmatpush1.bf16.msra.mxu1 %v4278_v12  ;;  %v4407_v11 = vld [vmem:[%s5655_s1 + $0x1c4] ss:$8 sps:$4 sm:$0xff]  }
  0x78   : > { %2969 = vmatpush1.bf16.msra.mxu0 %v4282_v13  ;;  %2427 = vmatprep.subr.bf16.mxu1 %v4289_v14  ;;  %v4410_v12 = vld [vmem:[%s5655_s1 + $0x4c4] ss:$8 sps:$4 sm:$0xff]  }
  0x79   : > { %2970 = vmatprep.subr.bf16.mxu0 %v4294_v15  ;;  %v4344_v13 = vld [vmem:[%s4829_s25 + $0x228] ss:$44 sps:$4 sm:$0xff]   ;;  %v4351_v14 = vld [vmem:[%s4829_s25 + $0x26c] ss:$44 sps:$4 sm:$0xff]   ;;  %v4353_v15 = vld [vmem:[%s4829_s25 + $0x284] ss:$44 sps:$4 sm:$0xff]  }
  0x7a   : > { %2285 = vmatmul.mubr.bf16.gmra.mrb[4].mxu1 %v4277_v16  ;;  %v4405_v16 = vld [vmem:[%s5655_s1 + $0x1c0] ss:$8 sps:$4 sm:$0xff]  }
  0x7b   : > { %2828 = vmatmul.mubr.bf16.gmra.mrb[4].mxu0 %v4281_v17  ;;  %2294 = vmatprep.mubr.bf16.mxu1 %v4285_v18  ;;  %v4408_v17 = vld [vmem:[%s5655_s1 + $0x4c0] ss:$8 sps:$4 sm:$0xff]   ;;  %v4419_v18 = vld [vmem:[%s5655_s1 + $0x1d4] ss:$8 sps:$4 sm:$0xff]  }
  0x7c   : > { %2837 = vmatprep.mubr.bf16.mxu0 %v4290_v20  ;;  %2428 = vmatpush1.bf16.msra.mxu1 %v4287_v19  ;;  %v4422_v19 = vld [vmem:[%s5655_s1 + $0x4d4] ss:$8 sps:$4 sm:$0xff]   ;;  %v4417_v20 = vld [vmem:[%s5655_s1 + $0x1d0] ss:$8 sps:$4 sm:$0xff]  }
  0x7d   : > { %2971 = vmatpush1.bf16.msra.mxu0 %v4292_v21  ;;  %2429 = vmatprep.subr.bf16.mxu1 %v4301_v22  ;;  %v4420_v21 = vld [vmem:[%s5655_s1 + $0x4d0] ss:$8 sps:$4 sm:$0xff]  }
  0x7e   : > { %2972 = vmatprep.subr.bf16.mxu0 %v4306_v23  ;;  %v4355_v22 = vld [vmem:[%s4829_s25 + $0x268] ss:$44 sps:$4 sm:$0xff]  }
  0x7f   : > { %v4431_v23 = vld [vmem:[%s5655_s1 + $0x1e4] ss:$8 sps:$4 sm:$0xff]  }
  0x80   : > { %2430 = vmatpush1.bf16.msra.mxu1 %v4299_v24  ;;  %v4356_v24 = vld [vmem:[%s4829_s25 + $0x280] ss:$44 sps:$4 sm:$0xff]  }
  0x81   : > { %2973 = vmatpush1.bf16.msra.mxu0 %v4304_v25  ;;  %2431 = vmatprep.subr.bf16.mxu1 %v4311_v27  ;;  %v4434_v25 = vld [vmem:[%s5655_s1 + $0x4e4] ss:$8 sps:$4 sm:$0xff]  }
  0x82   : > { %2974 = vmatprep.subr.bf16.mxu0 %v4314_v28  ;;  %2295 = vmatmul.mubr.bf16.gmra.mrb[8].mxu1 %v4295_v26  ;;  %v4363_v26 = vld [vmem:[%s4829_s25 + $0x2c4] ss:$44 sps:$4 sm:$0xff]   ;;  %v4365_v27 = vld [vmem:[%s4829_s25 + $0x2dc] ss:$44 sps:$4 sm:$0xff]  }
  0x83   : > { %2838 = vmatmul.mubr.bf16.gmra.mrb[8].mxu0 %v4296_v29  ;;  %2304 = vmatprep.mubr.bf16.mxu1 %v4297_v30  ;;  %v4429_v28 = vld [vmem:[%s5655_s1 + $0x1e0] ss:$8 sps:$4 sm:$0xff]   ;;  %v4441_v30 = vld [vmem:[%s5655_s1 + $0x1f4] ss:$8 sps:$4 sm:$0xff]  }
  0x84   : > { %2847 = vmatprep.mubr.bf16.mxu0 %v4302_v31  ;;  %2432 = vmatpush1.bf16.msra.mxu1 %v4309_v32  ;;  %v4432_v29 = vld [vmem:[%s5655_s1 + $0x4e0] ss:$8 sps:$4 sm:$0xff]   ;;  %v4444_v31 = vld [vmem:[%s5655_s1 + $0x4f4] ss:$8 sps:$4 sm:$0xff]  }
  0x85   : > { %2975 = vmatpush1.bf16.msra.mxu0 %v4312_v33  ;;  %2433 = vmatprep.subr.bf16.mxu1 %v4323_v34  ;;  %v4367_v32 = vld [vmem:[%s4829_s25 + $0x2c0] ss:$44 sps:$4 sm:$0xff]   ;;  %v4368_v33 = vld [vmem:[%s4829_s25 + $0x2d8] ss:$44 sps:$4 sm:$0xff]  }
  0x86   : > { %2976 = vmatprep.subr.bf16.mxu0 %v4326_v35  ;;  %v4439_v34 = vld [vmem:[%s5655_s1 + $0x1f0] ss:$8 sps:$4 sm:$0xff]  }
  0x87   : > { %v4442_v35 = vld [vmem:[%s5655_s1 + $0x4f0] ss:$8 sps:$4 sm:$0xff]  }
  0x88   : > { %2434 = vmatpush1.bf16.msra.mxu1 %v4321_v36  ;;  %v4375_v36 = vld [vmem:[%s4829_s25 + $0x31c] ss:$44 sps:$4 sm:$0xff]  }
  0x89   : > { %2977 = vmatpush1.bf16.msra.mxu0 %v4324_v39  ;;  %2435 = vmatprep.subr.bf16.mxu1 %v4335_v40  ;;  %v4456_v39 = vld [vmem:[%s5655_s1 + $0x504] ss:$8 sps:$4 sm:$0xff]  }
  0x8a   : > { %2978 = vmatprep.subr.bf16.mxu0 %v4338_v41  ;;  %2305 = vmatmul.mubr.bf16.gmra.mrb[12].mxu1 %v4307_v37  ;;  %v4453_v37 = vld [vmem:[%s5655_s1 + $0x204] ss:$8 sps:$4 sm:$0xff]  }
  0x8b   : > { %2848 = vmatmul.mubr.bf16.gmra.mrb[12].mxu0 %v4308_v38  ;;  %2314 = vmatprep.mubr.bf16.mxu1 %v4315_v42  ;;  %v4377_v38 = vld [vmem:[%s4829_s25 + $0x334] ss:$44 sps:$4 sm:$0xff]   ;;  %v4379_v40 = vld [vmem:[%s4829_s25 + $0x318] ss:$44 sps:$4 sm:$0xff]   ;;  %v4380_v41 = vld [vmem:[%s4829_s25 + $0x330] ss:$44 sps:$4 sm:$0xff]  }
  0x8c   : > { %2857 = vmatprep.mubr.bf16.mxu0 %v4317_v43  ;;  %2436 = vmatpush1.bf16.msra.mxu1 %v4333_v44  ;;  %v4387_v42 = vld [vmem:[%s4829_s25 + $0x374] ss:$44 sps:$4 sm:$0xff]   ;;  %v4389_v43 = vld [vmem:[%s4829_s25 + $0x38c] ss:$44 sps:$4 sm:$0xff]   ;;  %v4391_v44 = vld [vmem:[%s4829_s25 + $0x370] ss:$44 sps:$4 sm:$0xff]  }
  0x8d   : > { %2979 = vmatpush1.bf16.msra.mxu0 %v4336_v45  ;;  %2437 = vmatprep.subr.bf16.mxu1 %v4347_v46  ;;  %v4392_v45 = vld [vmem:[%s4829_s25 + $0x388] ss:$44 sps:$4 sm:$0xff]   ;;  %v4399_v46 = vld [vmem:[%s4829_s25 + $0x3cc] ss:$44 sps:$4 sm:$0xff]  }
  0x8e   : > { %2980 = vmatprep.subr.bf16.mxu0 %v4350_v47  ;;  %v4401_v47 = vld [vmem:[%s4829_s25 + $0x3e4] ss:$44 sps:$4 sm:$0xff]  }
  0x90   : > { %2438 = vmatpush1.bf16.msra.mxu1 %v4345_v48  ;;  %v4403_v48 = vld [vmem:[%s4829_s25 + $0x3c8] ss:$44 sps:$4 sm:$0xff]  }
  0x91   : > { %2981 = vmatpush1.bf16.msra.mxu0 %v4348_v49  ;;  %2439 = vmatprep.subr.bf16.mxu1 %v4359_v51  ;;  %v4404_v49 = vld [vmem:[%s4829_s25 + $0x3e0] ss:$44 sps:$4 sm:$0xff]   ;;  %v4413_v51 = vld [vmem:[%s4829_s25 + $0x43c] ss:$44 sps:$4 sm:$0xff]  }
  0x92   : > { %2982 = vmatprep.subr.bf16.mxu0 %v4362_v52  ;;  %2315 = vmatmul.mubr.bf16.gmra.mrb[16].mxu1 %v4319_v50  ;;  %v4411_v50 = vld [vmem:[%s4829_s25 + $0x424] ss:$44 sps:$4 sm:$0xff]   ;;  %v4415_v52 = vld [vmem:[%s4829_s25 + $0x420] ss:$44 sps:$4 sm:$0xff]  }
  0x93   : > { %2858 = vmatmul.mubr.bf16.gmra.mrb[16].mxu0 %v4320_v53  ;;  %2324 = vmatprep.mubr.bf16.mxu1 %v4327_v54  ;;  %v4416_v53 = vld [vmem:[%s4829_s25 + $0x438] ss:$44 sps:$4 sm:$0xff]   ;;  %v4423_v54 = vld [vmem:[%s4829_s25 + $0x47c] ss:$44 sps:$4 sm:$0xff]  }
  0x94   : > { %2867 = vmatprep.mubr.bf16.mxu0 %v4329_v55  ;;  %2440 = vmatpush1.bf16.msra.mxu1 %v4357_v56  ;;  %v4425_v55 = vld [vmem:[%s4829_s25 + $0x494] ss:$44 sps:$4 sm:$0xff]  }
  0x95   : > { %2983 = vmatpush1.bf16.msra.mxu0 %v4360_v57  ;;  %2441 = vmatprep.subr.bf16.mxu1 %v4371_v58  ;;  %v338_v56 = vld [vmem:[%s4829_s25 + $0x4d0] sm:$0xff]  ;;  %v341_v57 = vld [vmem:[%s4829_s25 + $0x4e8] sm:$0xff]  ;;  %v4427_v58 = vld [vmem:[%s4829_s25 + $0x478] ss:$44 sps:$4 sm:$0xff]  }
  0x96   : > { %2984 = vmatprep.subr.bf16.mxu0 %v4374_v59  ;;  %v4428_v59 = vld [vmem:[%s4829_s25 + $0x490] ss:$44 sps:$4 sm:$0xff]  }
  0x98   : > { %2442 = vmatpush1.bf16.msra.mxu1 %v4369_v60  ;;  %v3619_v60 = vcombine.high %v338_v56, %v338_v56 }
  0x99   : > { %2985 = vmatpush1.bf16.msra.mxu0 %v4372_v63  ;;  %2443 = vmatprep.subr.bf16.mxu1 %v4383_v0  ;;  %v3624_v63 = vcombine.low %v341_v57, %v341_v57  ;;  %v4447_v0 = vld [vmem:[%s4829_s25 + $0xc] ss:$44 sps:$4 sm:$0xff]  }
  0x9a   : > { %2986 = vmatprep.subr.bf16.mxu0 %v4386_v1  ;;  %2325 = vmatmul.mubr.bf16.gmra.mrb[20].mxu1 %v4331_v61  ;;  %v3625_v61 = vcombine.high %v341_v57, %v341_v57  ;;  %v4450_v1 = vld [vmem:[%s4829_s25 + $0x24] ss:$44 sps:$4 sm:$0xff]   ;;  %v4511_v57 = vld [vmem:[%s4829_s25 + $0x21c] ss:$44 sps:$4 sm:$0xff]  }
  0x9b   : > { %2868 = vmatmul.mubr.bf16.gmra.mrb[20].mxu0 %v4332_v62  ;;  %2334 = vmatprep.mubr.bf16.mxu1 %v4339_v2  ;;  %v3618_v62 = vcombine.low %v338_v56, %v338_v56  ;;  %v4445_v2 = vld [vmem:[%s4829_s25 + $0x8] ss:$44 sps:$4 sm:$0xff]   ;;  %v4507_v56 = vld [vmem:[%s4829_s25 + $0x1d8] ss:$44 sps:$4 sm:$0xff]  }
  0x9c   : > { %2877 = vmatprep.mubr.bf16.mxu0 %v4341_v3  ;;  %2444 = vmatpush1.bf16.msra.mxu1 %v4381_v4  ;;  %v4448_v3 = vld [vmem:[%s4829_s25 + $0x20] ss:$44 sps:$4 sm:$0xff]  }
  0x9d   : > { %2987 = vmatpush1.bf16.msra.mxu0 %v4384_v5  ;;  %2445 = vmatprep.subr.bf16.mxu1 %v4395_v6  ;;  %v4451_v4 = vld [vmem:[%s5655_s1 + $0x200] ss:$8 sps:$4 sm:$0xff]  }
  0x9e   : > { %2988 = vmatprep.subr.bf16.mxu0 %v4398_v7  ;;  %v4454_v5 = vld [vmem:[%s5655_s1 + $0x500] ss:$8 sps:$4 sm:$0xff]  }
  0x9f   : > { %v4457_v6 = vld [vmem:[%s4829_s25 + $0x64] ss:$44 sps:$4 sm:$0xff]   ;;  %v4459_v7 = vld [vmem:[%s4829_s25 + $0x7c] ss:$44 sps:$4 sm:$0xff]  }
  0xa0   : > { %2446 = vmatpush1.bf16.msra.mxu1 %v4393_v8  ;;  %v4464_v8 = vld [vmem:[%s5655_s1 + $0x214] ss:$8 sps:$4 sm:$0xff]  }
  0xa1   : > { %2989 = vmatpush1.bf16.msra.mxu0 %v4396_v9  ;;  %2447 = vmatprep.subr.bf16.mxu1 %v4407_v11  ;;  %v4477_v9 = vld [vmem:[%s5655_s1 + $0x514] ss:$8 sps:$4 sm:$0xff]   ;;  %v4475_v11 = vld [vmem:[%s5655_s1 + $0x510] ss:$8 sps:$4 sm:$0xff]  }
  0xa2   : > { %2990 = vmatprep.subr.bf16.mxu0 %v4410_v12  ;;  %2335 = vmatmul.mubr.bf16.gmra.mrb[24].mxu1 %v4343_v10  ;;  %v4462_v10 = vld [vmem:[%s5655_s1 + $0x210] ss:$8 sps:$4 sm:$0xff]   ;;  %v4461_v12 = vld [vmem:[%s4829_s25 + $0x60] ss:$44 sps:$4 sm:$0xff]  }
  0xa3   : > { %2878 = vmatmul.mubr.bf16.gmra.mrb[24].mxu0 %v4344_v13  ;;  %2344 = vmatprep.mubr.bf16.mxu1 %v4351_v14  ;;  %v4470_v13 = vld [vmem:[%s5655_s1 + $0x224] ss:$8 sps:$4 sm:$0xff]  }
  0xa4   : > { %2887 = vmatprep.mubr.bf16.mxu0 %v4353_v15  ;;  %2448 = vmatpush1.bf16.msra.mxu1 %v4405_v16  ;;  %v4498_v14 = vld [vmem:[%s5655_s1 + $0x524] ss:$8 sps:$4 sm:$0xff]  }
  0xa5   : > { %2991 = vmatpush1.bf16.msra.mxu0 %v4408_v17  ;;  %2449 = vmatprep.subr.bf16.mxu1 %v4419_v18  ;;  %v4465_v15 = vld [vmem:[%s4829_s25 + $0x78] ss:$44 sps:$4 sm:$0xff]   ;;  %v4466_v16 = vld [vmem:[%s4829_s25 + $0xbc] ss:$44 sps:$4 sm:$0xff]   ;;  %v4471_v18 = vld [vmem:[%s4829_s25 + $0xd4] ss:$44 sps:$4 sm:$0xff]  }
  0xa6   : > { %2992 = vmatprep.subr.bf16.mxu0 %v4422_v19  ;;  %v4468_v17 = vld [vmem:[%s5655_s1 + $0x220] ss:$8 sps:$4 sm:$0xff]   ;;  %v4482_v19 = vld [vmem:[%s5655_s1 + $0x234] ss:$8 sps:$4 sm:$0xff]  }
  0xa8   : > { %2450 = vmatpush1.bf16.msra.mxu1 %v4417_v20  ;;  %v4496_v20 = vld [vmem:[%s5655_s1 + $0x520] ss:$8 sps:$4 sm:$0xff]  }
  0xa9   : > { %2993 = vmatpush1.bf16.msra.mxu0 %v4420_v21  ;;  %2451 = vmatprep.subr.bf16.mxu1 %v4431_v23  ;;  %v4519_v21 = vld [vmem:[%s5655_s1 + $0x534] ss:$8 sps:$4 sm:$0xff]  }
  0xaa   : > { %2994 = vmatprep.subr.bf16.mxu0 %v4434_v25  ;;  %2345 = vmatmul.mubr.bf16.gmra.mrb[28].mxu1 %v4355_v22  ;;  %v4480_v22 = vld [vmem:[%s5655_s1 + $0x230] ss:$8 sps:$4 sm:$0xff]   ;;  %v4489_v25 = vld [vmem:[%s5655_s1 + $0x244] ss:$8 sps:$4 sm:$0xff]  }
  0xab   : > { %2888 = vmatmul.mubr.bf16.gmra.mrb[28].mxu0 %v4356_v24  ;;  %2354 = vmatprep.mubr.bf16.mxu1 %v4363_v26  ;;  %v4473_v23 = vld [vmem:[%s4829_s25 + $0xb8] ss:$44 sps:$4 sm:$0xff]   ;;  %v4474_v24 = vld [vmem:[%s4829_s25 + $0xd0] ss:$44 sps:$4 sm:$0xff]  }
  0xac   : > { %2897 = vmatprep.mubr.bf16.mxu0 %v4365_v27  ;;  %2452 = vmatpush1.bf16.msra.mxu1 %v4429_v28  ;;  %v4517_v26 = vld [vmem:[%s5655_s1 + $0x530] ss:$8 sps:$4 sm:$0xff]  }
  0xad   : > { %2995 = vmatpush1.bf16.msra.mxu0 %v4432_v29  ;;  %2453 = vmatprep.subr.bf16.mxu1 %v4441_v30  ;;  %v4478_v27 = vld [vmem:[%s4829_s25 + $0x114] ss:$44 sps:$4 sm:$0xff]   ;;  %v4483_v28 = vld [vmem:[%s4829_s25 + $0x12c] ss:$44 sps:$4 sm:$0xff]  }
  0xae   : > { %2996 = vmatprep.subr.bf16.mxu0 %v4444_v31  ;;  %v4543_v29 = vld [vmem:[%s5655_s1 + $0x544] ss:$8 sps:$4 sm:$0xff]   ;;  %v4487_v30 = vld [vmem:[%s5655_s1 + $0x240] ss:$8 sps:$4 sm:$0xff]   ;;  %v4501_v31 = vld [vmem:[%s5655_s1 + $0x254] ss:$8 sps:$4 sm:$0xff]  }
  0xb0   : > { %2454 = vmatpush1.bf16.msra.mxu1 %v4439_v34  ;;  %v4499_v34 = vld [vmem:[%s5655_s1 + $0x250] ss:$8 sps:$4 sm:$0xff]  }
  0xb1   : > { %2997 = vmatpush1.bf16.msra.mxu0 %v4442_v35  ;;  %2604 = vmatprep.subr.bf16.mxu1 %v4453_v37  ;;  %v4562_v35 = vld [vmem:[%s5655_s1 + $0x550] ss:$8 sps:$4 sm:$0xff]   ;;  %v4589_v37 = vld [vmem:[%s5655_s1 + $0x564] ss:$8 sps:$4 sm:$0xff]  }
  0xb2   : > { %3147 = vmatprep.subr.bf16.mxu0 %v4456_v39  ;;  %2355 = vmatmul.mubr.bf16.gmra.mrb[32].mxu1 %v4367_v32  ;;  %v4541_v32 = vld [vmem:[%s5655_s1 + $0x540] ss:$8 sps:$4 sm:$0xff]  }
  0xb3   : > { %2898 = vmatmul.mubr.bf16.gmra.mrb[32].mxu0 %v4368_v33  ;;  %2364 = vmatprep.mubr.bf16.mxu1 %v4375_v36  ;;  %v4564_v33 = vld [vmem:[%s5655_s1 + $0x554] ss:$8 sps:$4 sm:$0xff]   ;;  %v4510_v36 = vld [vmem:[%s5655_s1 + $0x264] ss:$8 sps:$4 sm:$0xff]  }
  0xb4   : > { %2907 = vmatprep.mubr.bf16.mxu0 %v4377_v38  ;;  %v4485_v38 = vld [vmem:[%s4829_s25 + $0x110] ss:$44 sps:$4 sm:$0xff]   ;;  %v4486_v39 = vld [vmem:[%s4829_s25 + $0x128] ss:$44 sps:$4 sm:$0xff]  }
  0xba   : > { %2365 = vmatmul.mubr.bf16.gmra.mrb[36].mxu1 %v4379_v40  ;;  %v4490_v40 = vld [vmem:[%s4829_s25 + $0x16c] ss:$44 sps:$4 sm:$0xff]  }
  0xbb   : > { %2908 = vmatmul.mubr.bf16.gmra.mrb[36].mxu0 %v4380_v41  ;;  %2374 = vmatprep.mubr.bf16.mxu1 %v4387_v42  ;;  %v4492_v41 = vld [vmem:[%s4829_s25 + $0x184] ss:$44 sps:$4 sm:$0xff]  }
  0xbc   : > { %2917 = vmatprep.mubr.bf16.mxu0 %v4389_v43  ;;  %v4508_v42 = vld [vmem:[%s5655_s1 + $0x260] ss:$8 sps:$4 sm:$0xff]   ;;  %v4522_v43 = vld [vmem:[%s5655_s1 + $0x274] ss:$8 sps:$4 sm:$0xff]  }
  0xc2   : > { %2375 = vmatmul.mubr.bf16.gmra.mrb[40].mxu1 %v4391_v44  ;;  %v4587_v44 = vld [vmem:[%s5655_s1 + $0x560] ss:$8 sps:$4 sm:$0xff]  }
  0xc3   : > { %2918 = vmatmul.mubr.bf16.gmra.mrb[40].mxu0 %v4392_v45  ;;  %2384 = vmatprep.mubr.bf16.mxu1 %v4399_v46  ;;  %v4520_v45 = vld [vmem:[%s5655_s1 + $0x270] ss:$8 sps:$4 sm:$0xff]   ;;  %v4531_v46 = vld [vmem:[%s5655_s1 + $0x284] ss:$8 sps:$4 sm:$0xff]  }
  0xc4   : > { %2927 = vmatprep.mubr.bf16.mxu0 %v4401_v47  ;;  %v4494_v47 = vld [vmem:[%s4829_s25 + $0x168] ss:$44 sps:$4 sm:$0xff]  }
  0xca   : > { %2385 = vmatmul.mubr.bf16.gmra.mrb[44].mxu1 %v4403_v48  ;;  %v4495_v48 = vld [vmem:[%s4829_s25 + $0x180] ss:$44 sps:$4 sm:$0xff]  }
  0xcb   : > { %2928 = vmatmul.mubr.bf16.gmra.mrb[44].mxu0 %v4404_v49  ;;  %2394 = vmatprep.mubr.bf16.mxu1 %v4411_v50  ;;  %v4502_v49 = vld [vmem:[%s4829_s25 + $0x1c4] ss:$44 sps:$4 sm:$0xff]   ;;  %v4504_v50 = vld [vmem:[%s4829_s25 + $0x1dc] ss:$44 sps:$4 sm:$0xff]  }
  0xcc   : > { %2937 = vmatprep.mubr.bf16.mxu0 %v4413_v51  ;;  %v4529_v51 = vld [vmem:[%s5655_s1 + $0x280] ss:$8 sps:$4 sm:$0xff]  }
  0xd2   : > { %2395 = vmatmul.mubr.bf16.gmra.mrb[48].mxu1 %v4415_v52  ;;  %v4540_v52 = vld [vmem:[%s5655_s1 + $0x294] ss:$8 sps:$4 sm:$0xff]  }
  0xd3   : > { %2938 = vmatmul.mubr.bf16.gmra.mrb[48].mxu0 %v4416_v53  ;;  %2404 = vmatprep.mubr.bf16.mxu1 %v4423_v54  ;;  %v4538_v53 = vld [vmem:[%s5655_s1 + $0x290] ss:$8 sps:$4 sm:$0xff]   ;;  %v4552_v54 = vld [vmem:[%s5655_s1 + $0x2a4] ss:$8 sps:$4 sm:$0xff]  }
  0xd4   : > { %2947 = vmatprep.mubr.bf16.mxu0 %v4425_v55  ;;  %v4506_v55 = vld [vmem:[%s4829_s25 + $0x1c0] ss:$44 sps:$4 sm:$0xff]  }
  0xda   : > { %2405 = vmatmul.mubr.bf16.gmra.mrb[52].mxu1 %v4427_v58  ;;  %v4513_v58 = vld [vmem:[%s4829_s25 + $0x234] ss:$44 sps:$4 sm:$0xff]  }
  0xdb   : > { %2948 = vmatmul.mubr.bf16.gmra.mrb[52].mxu0 %v4428_v59  ;;  %2414 = vmatprep.mubr.bf16.mxu1 %v3619_v60  ;;  %v4550_v59 = vld [vmem:[%s5655_s1 + $0x2a0] ss:$8 sps:$4 sm:$0xff]   ;;  %v4561_v60 = vld [vmem:[%s5655_s1 + $0x2b4] ss:$8 sps:$4 sm:$0xff]  }
  0xdc   : > { %2957 = vmatprep.mubr.bf16.mxu0 %v3625_v61  ;;  %v4559_v61 = vld [vmem:[%s5655_s1 + $0x2b0] ss:$8 sps:$4 sm:$0xff]  }
  0xe2   : > { %2415 = vmatmul.mubr.bf16.gmra.mrb[56].mxu1 %v3618_v62  ;;  %v4573_v62 = vld [vmem:[%s5655_s1 + $0x2c4] ss:$8 sps:$4 sm:$0xff]  }
  0xe3   : > { %2958 = vmatmul.mubr.bf16.gmra.mrb[56].mxu0 %v3624_v63  ;;  %2455 = vmatprep.mubr.bf16.mxu1 %v4447_v0  ;;  %v4515_v63 = vld [vmem:[%s4829_s25 + $0x218] ss:$44 sps:$4 sm:$0xff]   ;;  %v4516_v0 = vld [vmem:[%s4829_s25 + $0x230] ss:$44 sps:$4 sm:$0xff]  }
  0xe4   : > { %2998 = vmatprep.mubr.bf16.mxu0 %v4450_v1  ;;  %v4523_v1 = vld [vmem:[%s4829_s25 + $0x274] ss:$44 sps:$4 sm:$0xff]  }
  0xea   : > { %2456 = vmatmul.mubr.bf16.vlgmr.msra.gmra.mrb[0].mxu1 %v4445_v2  ;;  %v4525_v2 = vld [vmem:[%s4829_s25 + $0x28c] ss:$44 sps:$4 sm:$0xff]  }
  0xeb   : > { %2999 = vmatmul.mubr.bf16.vlgmr.msra.gmra.mrb[0].mxu0 %v4448_v3  ;;  %2605 = vmatpush1.bf16.msra.mxu1 %v4451_v4  ;;  %v4571_v3 = vld [vmem:[%s5655_s1 + $0x2c0] ss:$8 sps:$4 sm:$0xff]   ;;  %v4582_v4 = vld [vmem:[%s5655_s1 + $0x2d4] ss:$8 sps:$4 sm:$0xff]  }
  0xec   : > { %3148 = vmatpush1.bf16.msra.mxu0 %v4454_v5  ;;  %2465 = vmatprep.mubr.bf16.mxu1 %v4457_v6  ;;  %v4580_v5 = vld [vmem:[%s5655_s1 + $0x2d0] ss:$8 sps:$4 sm:$0xff]   ;;  %v4594_v6 = vld [vmem:[%s5655_s1 + $0x2e4] ss:$8 sps:$4 sm:$0xff]  }
  0xed   : > { %3008 = vmatprep.mubr.bf16.mxu0 %v4459_v7  ;;  %2606 = vmatprep.subr.bf16.mxu1 %v4464_v8  ;;  %v4527_v7 = vld [vmem:[%s4829_s25 + $0x270] ss:$44 sps:$4 sm:$0xff]   ;;  %v4528_v8 = vld [vmem:[%s4829_s25 + $0x288] ss:$44 sps:$4 sm:$0xff]  }
  0xee   : > { %3149 = vmatprep.subr.bf16.mxu0 %v4477_v9  ;;  %v4532_v9 = vld [vmem:[%s4829_s25 + $0x2cc] ss:$44 sps:$4 sm:$0xff]  }
  0xef   : > { %2607 = vmatpush1.bf16.msra.mxu1 %v4462_v10  ;;  %v4534_v10 = vld [vmem:[%s4829_s25 + $0x2e4] ss:$44 sps:$4 sm:$0xff]  }
  0xf0   : > { %3150 = vmatpush1.bf16.msra.mxu0 %v4475_v11  ;;  %2608 = vmatprep.subr.bf16.mxu1 %v4470_v13  ;;  %v4592_v11 = vld [vmem:[%s5655_s1 + $0x2e0] ss:$8 sps:$4 sm:$0xff]   ;;  %v4599_v13 = vld [vmem:[%s5655_s1 + $0x2f0] ss:$8 sps:$4 sm:$0xff]  }
  0xf1   : > { %3151 = vmatprep.subr.bf16.mxu0 %v4498_v14  ;;  %v4536_v14 = vld [vmem:[%s4829_s25 + $0x2c8] ss:$44 sps:$4 sm:$0xff]  }
  0xf2   : > { %2466 = vmatmul.mubr.bf16.gmra.mrb[4].mxu1 %v4461_v12  ;;  %v4601_v12 = vld [vmem:[%s5655_s1 + $0x2f4] ss:$8 sps:$4 sm:$0xff]  }
  0xf3   : > { %3009 = vmatmul.mubr.bf16.gmra.mrb[4].mxu0 %v4465_v15  ;;  %2475 = vmatprep.mubr.bf16.mxu1 %v4466_v16  ;;  %v4537_v15 = vld [vmem:[%s4829_s25 + $0x2e0] ss:$44 sps:$4 sm:$0xff]   ;;  %v4544_v16 = vld [vmem:[%s4829_s25 + $0x324] ss:$44 sps:$4 sm:$0xff]  }
  0xf4   : > { %3018 = vmatprep.mubr.bf16.mxu0 %v4471_v18  ;;  %2609 = vmatpush1.bf16.msra.mxu1 %v4468_v17  ;;  %v4546_v17 = vld [vmem:[%s4829_s25 + $0x33c] ss:$44 sps:$4 sm:$0xff]   ;;  %v4548_v18 = vld [vmem:[%s4829_s25 + $0x320] ss:$44 sps:$4 sm:$0xff]  }
  0xf5   : > { %3152 = vmatpush1.bf16.msra.mxu0 %v4496_v20  ;;  %2610 = vmatprep.subr.bf16.mxu1 %v4482_v19  ;;  %v4549_v19 = vld [vmem:[%s4829_s25 + $0x338] ss:$44 sps:$4 sm:$0xff]   ;;  %v4553_v20 = vld [vmem:[%s4829_s25 + $0x37c] ss:$44 sps:$4 sm:$0xff]  }
  0xf6   : > { %3153 = vmatprep.subr.bf16.mxu0 %v4519_v21  ;;  %v4555_v21 = vld [vmem:[%s4829_s25 + $0x394] ss:$44 sps:$4 sm:$0xff]  }
  0xf8   : > { %2611 = vmatpush1.bf16.msra.mxu1 %v4480_v22  ;;  %v4557_v22 = vld [vmem:[%s4829_s25 + $0x378] ss:$44 sps:$4 sm:$0xff]  }
  0xf9   : > { %3154 = vmatpush1.bf16.msra.mxu0 %v4517_v26  ;;  %2612 = vmatprep.subr.bf16.mxu1 %v4489_v25  ;;  %v4567_v25 = vld [vmem:[%s4829_s25 + $0x3ec] ss:$44 sps:$4 sm:$0xff]   ;;  %v4569_v26 = vld [vmem:[%s4829_s25 + $0x3d0] ss:$44 sps:$4 sm:$0xff]  }
  0xfa   : > { %3155 = vmatprep.subr.bf16.mxu0 %v4543_v29  ;;  %2476 = vmatmul.mubr.bf16.gmra.mrb[8].mxu1 %v4473_v23  ;;  %v4558_v23 = vld [vmem:[%s4829_s25 + $0x390] ss:$44 sps:$4 sm:$0xff]  }
  0xfb   : > { %3019 = vmatmul.mubr.bf16.gmra.mrb[8].mxu0 %v4474_v24  ;;  %2485 = vmatprep.mubr.bf16.mxu1 %v4478_v27  ;;  %v4565_v24 = vld [vmem:[%s4829_s25 + $0x3d4] ss:$44 sps:$4 sm:$0xff]   ;;  %v4576_v29 = vld [vmem:[%s4829_s25 + $0x444] ss:$44 sps:$4 sm:$0xff]  }
  0xfc   : > { %3028 = vmatprep.mubr.bf16.mxu0 %v4483_v28  ;;  %2613 = vmatpush1.bf16.msra.mxu1 %v4487_v30  ;;  %v4570_v27 = vld [vmem:[%s4829_s25 + $0x3e8] ss:$44 sps:$4 sm:$0xff]   ;;  %v4574_v28 = vld [vmem:[%s4829_s25 + $0x42c] ss:$44 sps:$4 sm:$0xff]  }
  0xfd   : > { %3156 = vmatpush1.bf16.msra.mxu0 %v4541_v32  ;;  %2614 = vmatprep.subr.bf16.mxu1 %v4501_v31  ;;  %v4578_v30 = vld [vmem:[%s4829_s25 + $0x428] ss:$44 sps:$4 sm:$0xff]   ;;  %v4579_v31 = vld [vmem:[%s4829_s25 + $0x440] ss:$44 sps:$4 sm:$0xff]   ;;  %v4583_v32 = vld [vmem:[%s4829_s25 + $0x484] ss:$44 sps:$4 sm:$0xff]  }
  0xfe   : > { %3157 = vmatprep.subr.bf16.mxu0 %v4564_v33  ;;  %v4585_v33 = vld [vmem:[%s4829_s25 + $0x49c] ss:$44 sps:$4 sm:$0xff]  }
 0x100   : > { %2615 = vmatpush1.bf16.msra.mxu1 %v4499_v34  ;;  %v339_v34 = vld [vmem:[%s4829_s25 + $0x4d8] sm:$0xff] }
 0x101   : > { %3158 = vmatpush1.bf16.msra.mxu0 %v4562_v35  ;;  %2616 = vmatprep.subr.bf16.mxu1 %v4510_v36  ;;  %v342_v35 = vld [vmem:[%s4829_s25 + $0x4f0] sm:$0xff]  ;;  %v4590_v36 = vld [vmem:[%s4829_s25 + $0x480] ss:$44 sps:$4 sm:$0xff]  }
 0x102   : > { %3159 = vmatprep.subr.bf16.mxu0 %v4589_v37  ;;  %2486 = vmatmul.mubr.bf16.gmra.mrb[12].mxu1 %v4485_v38  ;;  %v4591_v37 = vld [vmem:[%s4829_s25 + $0x498] ss:$44 sps:$4 sm:$0xff]   ;;  %v3621_v38 = vcombine.high %v339_v34, %v339_v34 }
 0x103   : > { %3029 = vmatmul.mubr.bf16.gmra.mrb[12].mxu0 %v4486_v39  ;;  %2495 = vmatprep.mubr.bf16.mxu1 %v4490_v40  ;;  %v3627_v39 = vcombine.high %v342_v35, %v342_v35  ;;  %v3620_v40 = vcombine.low %v339_v34, %v339_v34 }
 0x104   : > { %3038 = vmatprep.mubr.bf16.mxu0 %v4492_v41  ;;  %2617 = vmatpush1.bf16.msra.mxu1 %v4508_v42  ;;  %v3626_v41 = vcombine.low %v342_v35, %v342_v35  ;;  %v4604_v42 = vld [vmem:[%s4829_s25 + $0x14] ss:$44 sps:$4 sm:$0xff]  }
 0x105   : > { %3160 = vmatpush1.bf16.msra.mxu0 %v4587_v44  ;;  %2618 = vmatprep.subr.bf16.mxu1 %v4522_v43  ;;  %v4730_v43 = vmov 0   ;;  %v4602_v44 = vld [vmem:[%s4829_s25 + $0x10] ss:$44 sps:$4 sm:$0xff]  }
 0x108   : > { %2619 = vmatpush1.bf16.msra.mxu1 %v4520_v45  ;;  %v4605_v45 = vld [vmem:[%s4829_s25 + $0x28] ss:$44 sps:$4 sm:$0xff]  }
 0x109   : > { %2620 = vmatprep.subr.bf16.mxu1 %v4531_v46  ;;  %v4606_v46 = vld [vmem:[%s4829_s25 + $0x6c] ss:$44 sps:$4 sm:$0xff]  }
 0x10a   : > { %2496 = vmatmul.mubr.bf16.gmra.mrb[16].mxu1 %v4494_v47  ;;  %v4608_v47 = vld [vmem:[%s4829_s25 + $0x68] ss:$44 sps:$4 sm:$0xff]  }
 0x10b   : > { %3039 = vmatmul.mubr.bf16.gmra.mrb[16].mxu0 %v4495_v48  ;;  %2505 = vmatprep.mubr.bf16.mxu1 %v4502_v49  ;;  %v4609_v48 = vld [vmem:[%s4829_s25 + $0x80] ss:$44 sps:$4 sm:$0xff]   ;;  %v4610_v49 = vld [vmem:[%s4829_s25 + $0xc4] ss:$44 sps:$4 sm:$0xff]  }
 0x10c   : > { %3048 = vmatprep.mubr.bf16.mxu0 %v4504_v50  ;;  %2621 = vmatpush1.bf16.msra.mxu1 %v4529_v51  ;;  %v4612_v50 = vld [vmem:[%s4829_s25 + $0xc0] ss:$44 sps:$4 sm:$0xff]   ;;  %v4613_v51 = vld [vmem:[%s4829_s25 + $0xd8] ss:$44 sps:$4 sm:$0xff]  }
 0x10d   : > { %2622 = vmatprep.subr.bf16.mxu1 %v4540_v52  ;;  %v4614_v52 = vld [vmem:[%s4829_s25 + $0x11c] ss:$44 sps:$4 sm:$0xff]  }
 0x110   : > { %2623 = vmatpush1.bf16.msra.mxu1 %v4538_v53  ;;  %v4616_v53 = vld [vmem:[%s4829_s25 + $0x118] ss:$44 sps:$4 sm:$0xff]  }
 0x111   : > { %2624 = vmatprep.subr.bf16.mxu1 %v4552_v54  ;;  %v4617_v54 = vld [vmem:[%s4829_s25 + $0x130] ss:$44 sps:$4 sm:$0xff]  }
 0x112   : > { %2506 = vmatmul.mubr.bf16.gmra.mrb[20].mxu1 %v4506_v55  ;;  %v4618_v55 = vld [vmem:[%s4829_s25 + $0x174] ss:$44 sps:$4 sm:$0xff]  }
 0x113   : > { %3049 = vmatmul.mubr.bf16.gmra.mrb[20].mxu0 %v4507_v56  ;;  %2515 = vmatprep.mubr.bf16.mxu1 %v4511_v57  ;;  %v4620_v56 = vld [vmem:[%s4829_s25 + $0x170] ss:$44 sps:$4 sm:$0xff]   ;;  %v4621_v57 = vld [vmem:[%s4829_s25 + $0x188] ss:$44 sps:$4 sm:$0xff]  }
 0x114   : > { %3058 = vmatprep.mubr.bf16.mxu0 %v4513_v58  ;;  %2625 = vmatpush1.bf16.msra.mxu1 %v4550_v59  ;;  %v4622_v58 = vld [vmem:[%s4829_s25 + $0x1cc] ss:$44 sps:$4 sm:$0xff]   ;;  %v4624_v59 = vld [vmem:[%s4829_s25 + $0x1c8] ss:$44 sps:$4 sm:$0xff]  }
 0x115   : > { %2626 = vmatprep.subr.bf16.mxu1 %v4561_v60  ;;  %v4625_v60 = vld [vmem:[%s4829_s25 + $0x1e0] ss:$44 sps:$4 sm:$0xff]  }
 0x118   : > { %2627 = vmatpush1.bf16.msra.mxu1 %v4559_v61  ;;  %v4626_v61 = vld [vmem:[%s4829_s25 + $0x224] ss:$44 sps:$4 sm:$0xff]  }
 0x119   : > { %2628 = vmatprep.subr.bf16.mxu1 %v4573_v62  ;;  %v4628_v62 = vld [vmem:[%s4829_s25 + $0x220] ss:$44 sps:$4 sm:$0xff]  }
 0x11a   : > { %2516 = vmatmul.mubr.bf16.gmra.mrb[24].mxu1 %v4515_v63  ;;  %v4629_v63 = vld [vmem:[%s4829_s25 + $0x238] ss:$44 sps:$4 sm:$0xff]  }
 0x11b   : > { %3059 = vmatmul.mubr.bf16.gmra.mrb[24].mxu0 %v4516_v0  ;;  %2525 = vmatprep.mubr.bf16.mxu1 %v4523_v1  ;;  %v4630_v0 = vld [vmem:[%s4829_s25 + $0x27c] ss:$44 sps:$4 sm:$0xff]   ;;  %v4632_v1 = vld [vmem:[%s4829_s25 + $0x278] ss:$44 sps:$4 sm:$0xff]  }
 0x11c   : > { %3068 = vmatprep.mubr.bf16.mxu0 %v4525_v2  ;;  %2629 = vmatpush1.bf16.msra.mxu1 %v4571_v3  ;;  %v4633_v2 = vld [vmem:[%s4829_s25 + $0x290] ss:$44 sps:$4 sm:$0xff]   ;;  %v4634_v3 = vld [vmem:[%s4829_s25 + $0x2d4] ss:$44 sps:$4 sm:$0xff]  }
 0x11d   : > { %2630 = vmatprep.subr.bf16.mxu1 %v4582_v4  ;;  %v4636_v4 = vld [vmem:[%s4829_s25 + $0x2d0] ss:$44 sps:$4 sm:$0xff]  }
 0x120   : > { %2631 = vmatpush1.bf16.msra.mxu1 %v4580_v5  ;;  %v4637_v5 = vld [vmem:[%s4829_s25 + $0x2e8] ss:$44 sps:$4 sm:$0xff]  }
 0x121   : > { %2632 = vmatprep.subr.bf16.mxu1 %v4594_v6  ;;  %v4638_v6 = vld [vmem:[%s4829_s25 + $0x32c] ss:$44 sps:$4 sm:$0xff]  }
 0x122   : > { %2526 = vmatmul.mubr.bf16.gmra.mrb[28].mxu1 %v4527_v7  ;;  %v4640_v7 = vld [vmem:[%s4829_s25 + $0x328] ss:$44 sps:$4 sm:$0xff]  }
 0x123   : > { %3069 = vmatmul.mubr.bf16.gmra.mrb[28].mxu0 %v4528_v8  ;;  %2535 = vmatprep.mubr.bf16.mxu1 %v4532_v9  ;;  %v4641_v8 = vld [vmem:[%s4829_s25 + $0x340] ss:$44 sps:$4 sm:$0xff]   ;;  %v4642_v9 = vld [vmem:[%s4829_s25 + $0x384] ss:$44 sps:$4 sm:$0xff]  }
 0x124   : > { %3078 = vmatprep.mubr.bf16.mxu0 %v4534_v10  ;;  %2633 = vmatpush1.bf16.msra.mxu1 %v4592_v11  ;;  %v4644_v10 = vld [vmem:[%s4829_s25 + $0x380] ss:$44 sps:$4 sm:$0xff]   ;;  %v4645_v11 = vld [vmem:[%s4829_s25 + $0x398] ss:$44 sps:$4 sm:$0xff]  }
 0x125   : > { %2634 = vmatprep.subr.bf16.mxu1 %v4601_v12  ;;  %v4646_v12 = vld [vmem:[%s4829_s25 + $0x3dc] ss:$44 sps:$4 sm:$0xff]  }
 0x128   : > { %2635 = vmatpush1.bf16.msra.mxu1 %v4599_v13  ;;  %v4648_v13 = vld [vmem:[%s4829_s25 + $0x3d8] ss:$44 sps:$4 sm:$0xff]  }
 0x12a   : > { %2536 = vmatmul.mubr.bf16.gmra.mrb[32].mxu1 %v4536_v14  ;;  %v4649_v14 = vld [vmem:[%s4829_s25 + $0x3f0] ss:$44 sps:$4 sm:$0xff]  }
 0x12b   : > { %3079 = vmatmul.mubr.bf16.gmra.mrb[32].mxu0 %v4537_v15  ;;  %2545 = vmatprep.mubr.bf16.mxu1 %v4544_v16  ;;  %v4650_v15 = vld [vmem:[%s4829_s25 + $0x434] ss:$44 sps:$4 sm:$0xff]   ;;  %v4652_v16 = vld [vmem:[%s4829_s25 + $0x430] ss:$44 sps:$4 sm:$0xff]  }
 0x12c   : > { %3088 = vmatprep.mubr.bf16.mxu0 %v4546_v17  ;;  %v4653_v17 = vld [vmem:[%s4829_s25 + $0x448] ss:$44 sps:$4 sm:$0xff]  }
 0x132   : > { %2546 = vmatmul.mubr.bf16.gmra.mrb[36].mxu1 %v4548_v18  ;;  %v4654_v18 = vld [vmem:[%s4829_s25 + $0x48c] ss:$44 sps:$4 sm:$0xff]  }
 0x133   : > { %3089 = vmatmul.mubr.bf16.gmra.mrb[36].mxu0 %v4549_v19  ;;  %2555 = vmatprep.mubr.bf16.mxu1 %v4553_v20  ;;  %v340_v19 = vld [vmem:[%s4829_s25 + $0x4e0] sm:$0xff]  ;;  %v4656_v20 = vld [vmem:[%s4829_s25 + $0x488] ss:$44 sps:$4 sm:$0xff]  }
 0x134   : > { %3098 = vmatprep.mubr.bf16.mxu0 %v4555_v21  ;;  %v4657_v21 = vld [vmem:[%s4829_s25 + $0x4a0] ss:$44 sps:$4 sm:$0xff]  }
 0x13a   : > { %2556 = vmatmul.mubr.bf16.gmra.mrb[40].mxu1 %v4557_v22  ;;  %v3623_v22 = vcombine.high %v340_v19, %v340_v19 }
 0x13b   : > { %3099 = vmatmul.mubr.bf16.gmra.mrb[40].mxu0 %v4558_v23  ;;  %2565 = vmatprep.mubr.bf16.mxu1 %v4565_v24  ;;  %v3622_v23 = vcombine.low %v340_v19, %v340_v19  ;;  %v4660_v24 = vld [vmem:[%s4829_s25 + $0x4f8] ss:$0 sps:$4 sm:$0xff]  }
 0x13c   : > { %3108 = vmatprep.mubr.bf16.mxu0 %v4567_v25 }
 0x142   : > { %2566 = vmatmul.mubr.bf16.gmra.mrb[44].mxu1 %v4569_v26 }
 0x143   : > { %3109 = vmatmul.mubr.bf16.gmra.mrb[44].mxu0 %v4570_v27  ;;  %2575 = vmatprep.mubr.bf16.mxu1 %v4574_v28 }
 0x144   : > { %3118 = vmatprep.mubr.bf16.mxu0 %v4576_v29 }
 0x14a   : > { %2576 = vmatmul.mubr.bf16.gmra.mrb[48].mxu1 %v4578_v30 }
 0x14b   : > { %3119 = vmatmul.mubr.bf16.gmra.mrb[48].mxu0 %v4579_v31  ;;  %2585 = vmatprep.mubr.bf16.mxu1 %v4583_v32 }
 0x14c   : > { %3128 = vmatprep.mubr.bf16.mxu0 %v4585_v33 }
 0x152   : > { %2586 = vmatmul.mubr.bf16.gmra.mrb[52].mxu1 %v4590_v36 }
 0x153   : > { %3129 = vmatmul.mubr.bf16.gmra.mrb[52].mxu0 %v4591_v37  ;;  %2595 = vmatprep.mubr.bf16.mxu1 %v3621_v38 }
 0x154   : > { %3138 = vmatprep.mubr.bf16.mxu0 %v3627_v39 }
 0x15a   : > { %2596 = vmatmul.mubr.bf16.gmra.mrb[56].mxu1 %v3620_v40 }
 0x15b   : > { %3139 = vmatmul.mubr.bf16.gmra.mrb[56].mxu0 %v3626_v41  ;;  %2636 = vmatprep.mubr.bf16.mxu1 %v4604_v42 }
 0x15c   : > { %3179 = vmatprep.mubr.bf16.mxu0 %v4730_v43 }
 0x162   : > { %2637 = vmatmul.mubr.bf16.vlgmr.msra.gmra.mrb[0].mxu1 %v4602_v44 }
 0x163   : > { %3803 = vmatmul.mubr.msk.bf16.vlgmr.msra.gmra.mrb[0].mxu0 %vm2196_vm0, %v4605_v45  ;;  %2646 = vmatprep.mubr.bf16.mxu1 %v4606_v46 }
 0x164   : > { %3189 = vmatprep.mubr.bf16.mxu0 %v4730_v43 }
 0x16a   : > { %2647 = vmatmul.mubr.bf16.gmra.mrb[4].mxu1 %v4608_v47 }
 0x16b   : > { %3804 = vmatmul.mubr.msk.bf16.gmra.mrb[4].mxu0 %vm2196_vm0, %v4609_v48  ;;  %2656 = vmatprep.mubr.bf16.mxu1 %v4610_v49 }
 0x16c   : > { %3199 = vmatprep.mubr.bf16.mxu0 %v4730_v43 }
 0x172   : > { %2657 = vmatmul.mubr.bf16.gmra.mrb[8].mxu1 %v4612_v50 }
 0x173   : > { %3805 = vmatmul.mubr.msk.bf16.gmra.mrb[8].mxu0 %vm2196_vm0, %v4613_v51  ;;  %2666 = vmatprep.mubr.bf16.mxu1 %v4614_v52 }
 0x174   : > { %3209 = vmatprep.mubr.bf16.mxu0 %v4730_v43 }
 0x17a   : > { %2667 = vmatmul.mubr.bf16.gmra.mrb[12].mxu1 %v4616_v53 }
 0x17b   : > { %3806 = vmatmul.mubr.msk.bf16.gmra.mrb[12].mxu0 %vm2196_vm0, %v4617_v54  ;;  %2676 = vmatprep.mubr.bf16.mxu1 %v4618_v55 }
 0x17c   : > { %3219 = vmatprep.mubr.bf16.mxu0 %v4730_v43 }
 0x182   : > { %2677 = vmatmul.mubr.bf16.gmra.mrb[16].mxu1 %v4620_v56 }
 0x183   : > { %3807 = vmatmul.mubr.msk.bf16.gmra.mrb[16].mxu0 %vm2196_vm0, %v4621_v57  ;;  %2686 = vmatprep.mubr.bf16.mxu1 %v4622_v58 }
 0x184   : > { %3229 = vmatprep.mubr.bf16.mxu0 %v4730_v43 }
 0x18a   : > { %2687 = vmatmul.mubr.bf16.gmra.mrb[20].mxu1 %v4624_v59 }
 0x18b   : > { %3808 = vmatmul.mubr.msk.bf16.gmra.mrb[20].mxu0 %vm2196_vm0, %v4625_v60  ;;  %2696 = vmatprep.mubr.bf16.mxu1 %v4626_v61 }
 0x18c   : > { %3239 = vmatprep.mubr.bf16.mxu0 %v4730_v43 }
 0x192   : > { %2697 = vmatmul.mubr.bf16.gmra.mrb[24].mxu1 %v4628_v62 }
 0x193   : > { %3809 = vmatmul.mubr.msk.bf16.gmra.mrb[24].mxu0 %vm2196_vm0, %v4629_v63  ;;  %2706 = vmatprep.mubr.bf16.mxu1 %v4630_v0 }
 0x194   : > { %3249 = vmatprep.mubr.bf16.mxu0 %v4730_v43 }
 0x19a   : > { %2707 = vmatmul.mubr.bf16.gmra.mrb[28].mxu1 %v4632_v1 }
 0x19b   : > { %3810 = vmatmul.mubr.msk.bf16.gmra.mrb[28].mxu0 %vm2196_vm0, %v4633_v2  ;;  %2716 = vmatprep.mubr.bf16.mxu1 %v4634_v3 }
 0x19c   : > { %3259 = vmatprep.mubr.bf16.mxu0 %v4730_v43 }
 0x1a2   : > { %2717 = vmatmul.mubr.bf16.gmra.mrb[32].mxu1 %v4636_v4 }
 0x1a3   : > { %3811 = vmatmul.mubr.msk.bf16.gmra.mrb[32].mxu0 %vm2196_vm0, %v4637_v5  ;;  %2726 = vmatprep.mubr.bf16.mxu1 %v4638_v6 }
 0x1a4   : > { %3269 = vmatprep.mubr.bf16.mxu0 %v4730_v43 }
 0x1aa   : > { %2727 = vmatmul.mubr.bf16.gmra.mrb[36].mxu1 %v4640_v7 }
 0x1ab   : > { %3812 = vmatmul.mubr.msk.bf16.gmra.mrb[36].mxu0 %vm2196_vm0, %v4641_v8  ;;  %2736 = vmatprep.mubr.bf16.mxu1 %v4642_v9 }
 0x1ac   : > { %3279 = vmatprep.mubr.bf16.mxu0 %v4730_v43 }
 0x1b2   : > { %2737 = vmatmul.mubr.bf16.gmra.mrb[40].mxu1 %v4644_v10 }
 0x1b3   : > { %3813 = vmatmul.mubr.msk.bf16.gmra.mrb[40].mxu0 %vm2196_vm0, %v4645_v11  ;;  %2746 = vmatprep.mubr.bf16.mxu1 %v4646_v12 }
 0x1b4   : > { %3289 = vmatprep.mubr.bf16.mxu0 %v4730_v43 }
 0x1ba   : > { %2747 = vmatmul.mubr.bf16.gmra.mrb[44].mxu1 %v4648_v13 }
 0x1bb   : > { %3814 = vmatmul.mubr.msk.bf16.gmra.mrb[44].mxu0 %vm2196_vm0, %v4649_v14  ;;  %2756 = vmatprep.mubr.bf16.mxu1 %v4650_v15 }
 0x1bc   : > { %3299 = vmatprep.mubr.bf16.mxu0 %v4730_v43 }
 0x1c2   : > { %2757 = vmatmul.mubr.bf16.gmra.mrb[48].mxu1 %v4652_v16 }
 0x1c3   : > { %3815 = vmatmul.mubr.msk.bf16.gmra.mrb[48].mxu0 %vm2196_vm0, %v4653_v17  ;;  %2766 = vmatprep.mubr.bf16.mxu1 %v4654_v18 }
 0x1c4   : > { %3309 = vmatprep.mubr.bf16.mxu0 %v4730_v43 }
 0x1ca   : > { %2767 = vmatmul.mubr.bf16.gmra.mrb[52].mxu1 %v4656_v20 }
 0x1cb   : > { %3816 = vmatmul.mubr.msk.bf16.gmra.mrb[52].mxu0 %vm2196_vm0, %v4657_v21  ;;  %2776 = vmatprep.mubr.bf16.mxu1 %v3623_v22 }
 0x1cc   : > { %3319 = vmatprep.mubr.bf16.mxu0 %v4730_v43 }
 0x1d2   : > { %2777 = vmatmul.mubr.bf16.gmra.mrb[56].mxu1 %v3622_v23 }
 0x1d3   : > { %3817 = vmatmul.mubr.msk.bf16.gmra.mrb[56].mxu0 %vm2196_vm0, %v4660_v24 }
 0x235   : > { %v2638_v25 = vpop.f32.mrb[0].mxu1 }
 0x236   : > { %v3181_v26 = vpop.f32.mrb[0].mxu0  ;;  %v2640_v28 = vpop.f32.mrb[1].mxu1 }
 0x237   : > { %v3821_v27 = vadd.f32 %v3181_v26, %v2638_v25  ;;  %v3183_v29 = vpop.f32.mrb[1].mxu0  ;;  %v2642_v31 = vpop.f32.mrb[2].mxu1 }
 0x238   : > { %v3822_v30 = vadd.f32 %v3183_v29, %v2640_v28  ;;  %v3185_v32 = vpop.f32.mrb[2].mxu0  ;;  %v2644_v34 = vpop.f32.mrb[3].mxu1 }
 0x239   : > { %3328 = vst [vmem:[%s5552_s16] sm:$0xff] %v3821_v27  ;;  %v3823_v33 = vadd.f32 %v3185_v32, %v2642_v31  ;;  %v3187_v35 = vpop.f32.mrb[3].mxu0 }
 0x23a   : > { %3330 = vst.msk [vmem:[%s5552_s16 + $0x8] sm:$0xff] %vm3329_vm1, %v3822_v30  ;;  %v3824_v36 = vadd.f32 %v3187_v35, %v2644_v34 }
 0x23b   : > { %3331 = vst [vmem:[%s5552_s16 + $0x10] sm:$0xff] %v3823_v33 }
 0x23c   : > { %3332 = vst.msk [vmem:[%s5552_s16 + $0x18] sm:$0xff] %vm3329_vm1, %v3824_v36 }
 0x23d   : > { %v2648_v37 = vpop.f32.mrb[4].mxu1 }
 0x23e   : > { %v3191_v38 = vpop.f32.mrb[4].mxu0  ;;  %v2650_v40 = vpop.f32.mrb[5].mxu1 }
 0x23f   : > { %v3825_v39 = vadd.f32 %v3191_v38, %v2648_v37  ;;  %v3193_v41 = vpop.f32.mrb[5].mxu0  ;;  %v2652_v43 = vpop.f32.mrb[6].mxu1 }
 0x240   : > { %v3826_v42 = vadd.f32 %v3193_v41, %v2650_v40  ;;  %v3195_v44 = vpop.f32.mrb[6].mxu0  ;;  %v2654_v46 = vpop.f32.mrb[7].mxu1 }
 0x241   : > { %3333 = vst [vmem:[%s5552_s16 + $0x20] sm:$0xff] %v3825_v39  ;;  %v3827_v45 = vadd.f32 %v3195_v44, %v2652_v43  ;;  %v3197_v47 = vpop.f32.mrb[7].mxu0 }
 0x242   : > { %3334 = vst.msk [vmem:[%s5552_s16 + $0x28] sm:$0xff] %vm3329_vm1, %v3826_v42  ;;  %v3828_v48 = vadd.f32 %v3197_v47, %v2654_v46 }
 0x243   : > { %3335 = vst [vmem:[%s5552_s16 + $0x30] sm:$0xff] %v3827_v45 }
 0x244   : > { %3336 = vst.msk [vmem:[%s5552_s16 + $0x38] sm:$0xff] %vm3329_vm1, %v3828_v48 }
 0x245   : > { %v2658_v49 = vpop.f32.mrb[8].mxu1 }
 0x246   : > { %v3201_v50 = vpop.f32.mrb[8].mxu0  ;;  %v2660_v52 = vpop.f32.mrb[9].mxu1 }
 0x247   : > { %v3829_v51 = vadd.f32 %v3201_v50, %v2658_v49  ;;  %v3203_v53 = vpop.f32.mrb[9].mxu0  ;;  %v2662_v55 = vpop.f32.mrb[10].mxu1 }
 0x248   : > { %v3830_v54 = vadd.f32 %v3203_v53, %v2660_v52  ;;  %v3205_v56 = vpop.f32.mrb[10].mxu0  ;;  %v2664_v58 = vpop.f32.mrb[11].mxu1 }
 0x249   : > { %3337 = vst [vmem:[%s5552_s16 + $0x40] sm:$0xff] %v3829_v51  ;;  %v3831_v57 = vadd.f32 %v3205_v56, %v2662_v55  ;;  %v3207_v59 = vpop.f32.mrb[11].mxu0 }
 0x24a   : > { %3338 = vst.msk [vmem:[%s5552_s16 + $0x48] sm:$0xff] %vm3329_vm1, %v3830_v54  ;;  %v3832_v60 = vadd.f32 %v3207_v59, %v2664_v58 }
 0x24b   : > { %3339 = vst [vmem:[%s5552_s16 + $0x50] sm:$0xff] %v3831_v57 }
 0x24c   : > { %3340 = vst.msk [vmem:[%s5552_s16 + $0x58] sm:$0xff] %vm3329_vm1, %v3832_v60 }
 0x24d   : > { %v2668_v61 = vpop.f32.mrb[12].mxu1 }
 0x24e   : > { %v3211_v62 = vpop.f32.mrb[12].mxu0  ;;  %v2670_v0 = vpop.f32.mrb[13].mxu1 }
 0x24f   : > { %v3833_v63 = vadd.f32 %v3211_v62, %v2668_v61  ;;  %v3213_v1 = vpop.f32.mrb[13].mxu0  ;;  %v2672_v3 = vpop.f32.mrb[14].mxu1 }
 0x250   : > { %v3834_v2 = vadd.f32 %v3213_v1, %v2670_v0  ;;  %v3215_v4 = vpop.f32.mrb[14].mxu0  ;;  %v2674_v6 = vpop.f32.mrb[15].mxu1 }
 0x251   : > { %3341 = vst [vmem:[%s5552_s16 + $0x60] sm:$0xff] %v3833_v63  ;;  %v3835_v5 = vadd.f32 %v3215_v4, %v2672_v3  ;;  %v3217_v7 = vpop.f32.mrb[15].mxu0 }
 0x252   : > { %3342 = vst.msk [vmem:[%s5552_s16 + $0x68] sm:$0xff] %vm3329_vm1, %v3834_v2  ;;  %v3836_v8 = vadd.f32 %v3217_v7, %v2674_v6 }
 0x253   : > { %3343 = vst [vmem:[%s5552_s16 + $0x70] sm:$0xff] %v3835_v5 }
 0x254   : > { %3344 = vst.msk [vmem:[%s5552_s16 + $0x78] sm:$0xff] %vm3329_vm1, %v3836_v8 }
 0x255   : > { %v2678_v9 = vpop.f32.mrb[16].mxu1 }
 0x256   : > { %v3221_v10 = vpop.f32.mrb[16].mxu0  ;;  %v2680_v12 = vpop.f32.mrb[17].mxu1 }
 0x257   : > { %v3837_v11 = vadd.f32 %v3221_v10, %v2678_v9  ;;  %v3223_v13 = vpop.f32.mrb[17].mxu0  ;;  %v2682_v15 = vpop.f32.mrb[18].mxu1 }
 0x258   : > { %v3838_v14 = vadd.f32 %v3223_v13, %v2680_v12  ;;  %v3225_v16 = vpop.f32.mrb[18].mxu0  ;;  %v2684_v18 = vpop.f32.mrb[19].mxu1 }
 0x259   : > { %3345 = vst [vmem:[%s5552_s16 + $0x80] sm:$0xff] %v3837_v11  ;;  %v3839_v17 = vadd.f32 %v3225_v16, %v2682_v15  ;;  %v3227_v19 = vpop.f32.mrb[19].mxu0 }
 0x25a   : > { %3346 = vst.msk [vmem:[%s5552_s16 + $0x88] sm:$0xff] %vm3329_vm1, %v3838_v14  ;;  %v3840_v20 = vadd.f32 %v3227_v19, %v2684_v18 }
 0x25b   : > { %3347 = vst [vmem:[%s5552_s16 + $0x90] sm:$0xff] %v3839_v17 }
 0x25c   : > { %3348 = vst.msk [vmem:[%s5552_s16 + $0x98] sm:$0xff] %vm3329_vm1, %v3840_v20 }
 0x25d   : > { %v2688_v21 = vpop.f32.mrb[20].mxu1 }
 0x25e   : > { %v3231_v22 = vpop.f32.mrb[20].mxu0  ;;  %v2690_v24 = vpop.f32.mrb[21].mxu1 }
 0x25f   : > { %v3841_v23 = vadd.f32 %v3231_v22, %v2688_v21  ;;  %v3233_v25 = vpop.f32.mrb[21].mxu0  ;;  %v2692_v27 = vpop.f32.mrb[22].mxu1 }
 0x260   : > { %v3842_v26 = vadd.f32 %v3233_v25, %v2690_v24  ;;  %v3235_v28 = vpop.f32.mrb[22].mxu0  ;;  %v2694_v30 = vpop.f32.mrb[23].mxu1 }
 0x261   : > { %3349 = vst [vmem:[%s5552_s16 + $0xa0] sm:$0xff] %v3841_v23  ;;  %v3843_v29 = vadd.f32 %v3235_v28, %v2692_v27  ;;  %v3237_v31 = vpop.f32.mrb[23].mxu0 }
 0x262   : > { %3350 = vst.msk [vmem:[%s5552_s16 + $0xa8] sm:$0xff] %vm3329_vm1, %v3842_v26  ;;  %v3844_v32 = vadd.f32 %v3237_v31, %v2694_v30 }
 0x263   : > { %3351 = vst [vmem:[%s5552_s16 + $0xb0] sm:$0xff] %v3843_v29 }
 0x264   : > { %3352 = vst.msk [vmem:[%s5552_s16 + $0xb8] sm:$0xff] %vm3329_vm1, %v3844_v32 }
 0x265   : > { %v2698_v33 = vpop.f32.mrb[24].mxu1 }
 0x266   : > { %v3241_v34 = vpop.f32.mrb[24].mxu0  ;;  %v2700_v36 = vpop.f32.mrb[25].mxu1 }
 0x267   : > { %v3845_v35 = vadd.f32 %v3241_v34, %v2698_v33  ;;  %v3243_v37 = vpop.f32.mrb[25].mxu0  ;;  %v2702_v39 = vpop.f32.mrb[26].mxu1 }
 0x268   : > { %v3846_v38 = vadd.f32 %v3243_v37, %v2700_v36  ;;  %v3245_v40 = vpop.f32.mrb[26].mxu0  ;;  %v2704_v42 = vpop.f32.mrb[27].mxu1 }
 0x269   : > { %3353 = vst [vmem:[%s5552_s16 + $0xc0] sm:$0xff] %v3845_v35  ;;  %v3847_v41 = vadd.f32 %v3245_v40, %v2702_v39  ;;  %v3247_v43 = vpop.f32.mrb[27].mxu0 }
 0x26a   : > { %3354 = vst.msk [vmem:[%s5552_s16 + $0xc8] sm:$0xff] %vm3329_vm1, %v3846_v38  ;;  %v3848_v44 = vadd.f32 %v3247_v43, %v2704_v42 }
 0x26b   : > { %3355 = vst [vmem:[%s5552_s16 + $0xd0] sm:$0xff] %v3847_v41 }
 0x26c   : > { %3356 = vst.msk [vmem:[%s5552_s16 + $0xd8] sm:$0xff] %vm3329_vm1, %v3848_v44 }
 0x26d   : > { %v2708_v45 = vpop.f32.mrb[28].mxu1 }
 0x26e   : > { %v3251_v46 = vpop.f32.mrb[28].mxu0  ;;  %v2710_v48 = vpop.f32.mrb[29].mxu1 }
 0x26f   : > { %v3849_v47 = vadd.f32 %v3251_v46, %v2708_v45  ;;  %v3253_v49 = vpop.f32.mrb[29].mxu0  ;;  %v2712_v51 = vpop.f32.mrb[30].mxu1 }
 0x270   : > { %v3850_v50 = vadd.f32 %v3253_v49, %v2710_v48  ;;  %v3255_v52 = vpop.f32.mrb[30].mxu0  ;;  %v2714_v54 = vpop.f32.mrb[31].mxu1 }
 0x271   : > { %3357 = vst [vmem:[%s5552_s16 + $0xe0] sm:$0xff] %v3849_v47  ;;  %v3851_v53 = vadd.f32 %v3255_v52, %v2712_v51  ;;  %v3257_v55 = vpop.f32.mrb[31].mxu0 }
 0x272   : > { %3358 = vst.msk [vmem:[%s5552_s16 + $0xe8] sm:$0xff] %vm3329_vm1, %v3850_v50  ;;  %v3852_v56 = vadd.f32 %v3257_v55, %v2714_v54 }
 0x273   : > { %3359 = vst [vmem:[%s5552_s16 + $0xf0] sm:$0xff] %v3851_v53 }
 0x274   : > { %3360 = vst.msk [vmem:[%s5552_s16 + $0xf8] sm:$0xff] %vm3329_vm1, %v3852_v56 }
 0x275   : > { %v2718_v57 = vpop.f32.mrb[32].mxu1 }
 0x276   : > { %v3261_v58 = vpop.f32.mrb[32].mxu0  ;;  %v2720_v60 = vpop.f32.mrb[33].mxu1 }
 0x277   : > { %v3853_v59 = vadd.f32 %v3261_v58, %v2718_v57  ;;  %v3263_v61 = vpop.f32.mrb[33].mxu0  ;;  %v2722_v63 = vpop.f32.mrb[34].mxu1 }
 0x278   : > { %v3854_v62 = vadd.f32 %v3263_v61, %v2720_v60  ;;  %v3265_v0 = vpop.f32.mrb[34].mxu0  ;;  %v2724_v2 = vpop.f32.mrb[35].mxu1 }
 0x279   : > { %3361 = vst [vmem:[%s5552_s16 + $0x100] sm:$0xff] %v3853_v59  ;;  %v3855_v1 = vadd.f32 %v3265_v0, %v2722_v63  ;;  %v3267_v3 = vpop.f32.mrb[35].mxu0 }
 0x27a   : > { %3362 = vst.msk [vmem:[%s5552_s16 + $0x108] sm:$0xff] %vm3329_vm1, %v3854_v62  ;;  %v3856_v4 = vadd.f32 %v3267_v3, %v2724_v2 }
 0x27b   : > { %3363 = vst [vmem:[%s5552_s16 + $0x110] sm:$0xff] %v3855_v1 }
 0x27c   : > { %3364 = vst.msk [vmem:[%s5552_s16 + $0x118] sm:$0xff] %vm3329_vm1, %v3856_v4 }
 0x27d   : > { %v2728_v5 = vpop.f32.mrb[36].mxu1 }
 0x27e   : > { %v3271_v6 = vpop.f32.mrb[36].mxu0  ;;  %v2730_v8 = vpop.f32.mrb[37].mxu1 }
 0x27f   : > { %v3857_v7 = vadd.f32 %v3271_v6, %v2728_v5  ;;  %v3273_v9 = vpop.f32.mrb[37].mxu0  ;;  %v2732_v11 = vpop.f32.mrb[38].mxu1 }
 0x280   : > { %v3858_v10 = vadd.f32 %v3273_v9, %v2730_v8  ;;  %v3275_v12 = vpop.f32.mrb[38].mxu0  ;;  %v2734_v14 = vpop.f32.mrb[39].mxu1 }
 0x281   : > { %3365 = vst [vmem:[%s5552_s16 + $0x120] sm:$0xff] %v3857_v7  ;;  %v3859_v13 = vadd.f32 %v3275_v12, %v2732_v11  ;;  %v3277_v15 = vpop.f32.mrb[39].mxu0 }
 0x282   : > { %3366 = vst.msk [vmem:[%s5552_s16 + $0x128] sm:$0xff] %vm3329_vm1, %v3858_v10  ;;  %v3860_v16 = vadd.f32 %v3277_v15, %v2734_v14 }
 0x283   : > { %3367 = vst [vmem:[%s5552_s16 + $0x130] sm:$0xff] %v3859_v13 }
 0x284   : > { %3368 = vst.msk [vmem:[%s5552_s16 + $0x138] sm:$0xff] %vm3329_vm1, %v3860_v16 }
 0x285   : > { %v2738_v17 = vpop.f32.mrb[40].mxu1 }
 0x286   : > { %v3281_v18 = vpop.f32.mrb[40].mxu0  ;;  %v2740_v20 = vpop.f32.mrb[41].mxu1 }
 0x287   : > { %v3861_v19 = vadd.f32 %v3281_v18, %v2738_v17  ;;  %v3283_v21 = vpop.f32.mrb[41].mxu0  ;;  %v2742_v23 = vpop.f32.mrb[42].mxu1 }
 0x288   : > { %v3862_v22 = vadd.f32 %v3283_v21, %v2740_v20  ;;  %v3285_v24 = vpop.f32.mrb[42].mxu0  ;;  %v2744_v26 = vpop.f32.mrb[43].mxu1 }
 0x289   : > { %3369 = vst [vmem:[%s5552_s16 + $0x140] sm:$0xff] %v3861_v19  ;;  %v3863_v25 = vadd.f32 %v3285_v24, %v2742_v23  ;;  %v3287_v27 = vpop.f32.mrb[43].mxu0 }
 0x28a   : > { %3370 = vst.msk [vmem:[%s5552_s16 + $0x148] sm:$0xff] %vm3329_vm1, %v3862_v22  ;;  %v3864_v28 = vadd.f32 %v3287_v27, %v2744_v26 }
 0x28b   : > { %3371 = vst [vmem:[%s5552_s16 + $0x150] sm:$0xff] %v3863_v25 }
 0x28c   : > { %3372 = vst.msk [vmem:[%s5552_s16 + $0x158] sm:$0xff] %vm3329_vm1, %v3864_v28 }
 0x28d   : > { %v2748_v29 = vpop.f32.mrb[44].mxu1 }
 0x28e   : > { %v3291_v30 = vpop.f32.mrb[44].mxu0  ;;  %v2750_v32 = vpop.f32.mrb[45].mxu1 }
 0x28f   : > { %v3865_v31 = vadd.f32 %v3291_v30, %v2748_v29  ;;  %v3293_v33 = vpop.f32.mrb[45].mxu0  ;;  %v2752_v35 = vpop.f32.mrb[46].mxu1 }
 0x290   : > { %v3866_v34 = vadd.f32 %v3293_v33, %v2750_v32  ;;  %v3295_v36 = vpop.f32.mrb[46].mxu0  ;;  %v2754_v38 = vpop.f32.mrb[47].mxu1 }
 0x291   : > { %3373 = vst [vmem:[%s5552_s16 + $0x160] sm:$0xff] %v3865_v31  ;;  %v3867_v37 = vadd.f32 %v3295_v36, %v2752_v35  ;;  %v3297_v39 = vpop.f32.mrb[47].mxu0 }
 0x292   : > { %3374 = vst.msk [vmem:[%s5552_s16 + $0x168] sm:$0xff] %vm3329_vm1, %v3866_v34  ;;  %v3868_v40 = vadd.f32 %v3297_v39, %v2754_v38 }
 0x293   : > { %3375 = vst [vmem:[%s5552_s16 + $0x170] sm:$0xff] %v3867_v37 }
 0x294   : > { %3376 = vst.msk [vmem:[%s5552_s16 + $0x178] sm:$0xff] %vm3329_vm1, %v3868_v40 }
 0x295   : > { %v2758_v41 = vpop.f32.mrb[48].mxu1 }
 0x296   : > { %v3301_v42 = vpop.f32.mrb[48].mxu0  ;;  %v2760_v44 = vpop.f32.mrb[49].mxu1 }
 0x297   : > { %v3869_v43 = vadd.f32 %v3301_v42, %v2758_v41  ;;  %v3303_v45 = vpop.f32.mrb[49].mxu0  ;;  %v2762_v47 = vpop.f32.mrb[50].mxu1 }
 0x298   : > { %v3870_v46 = vadd.f32 %v3303_v45, %v2760_v44  ;;  %v3305_v48 = vpop.f32.mrb[50].mxu0  ;;  %v2764_v50 = vpop.f32.mrb[51].mxu1 }
 0x299   : > { %3377 = vst [vmem:[%s5552_s16 + $0x180] sm:$0xff] %v3869_v43  ;;  %v3871_v49 = vadd.f32 %v3305_v48, %v2762_v47  ;;  %v3307_v51 = vpop.f32.mrb[51].mxu0 }
 0x29a   : > { %3378 = vst.msk [vmem:[%s5552_s16 + $0x188] sm:$0xff] %vm3329_vm1, %v3870_v46  ;;  %v3872_v52 = vadd.f32 %v3307_v51, %v2764_v50 }
 0x29b   : > { %3379 = vst [vmem:[%s5552_s16 + $0x190] sm:$0xff] %v3871_v49 }
 0x29c   : > { %3380 = vst.msk [vmem:[%s5552_s16 + $0x198] sm:$0xff] %vm3329_vm1, %v3872_v52 }
 0x29d   : > { %v2768_v53 = vpop.f32.mrb[52].mxu1 }
 0x29e   : > { %v3311_v54 = vpop.f32.mrb[52].mxu0  ;;  %v2770_v56 = vpop.f32.mrb[53].mxu1 }
 0x29f   : > { %v3873_v55 = vadd.f32 %v3311_v54, %v2768_v53  ;;  %v3313_v57 = vpop.f32.mrb[53].mxu0  ;;  %v2772_v59 = vpop.f32.mrb[54].mxu1 }
 0x2a0   : > { %v3874_v58 = vadd.f32 %v3313_v57, %v2770_v56  ;;  %v3315_v60 = vpop.f32.mrb[54].mxu0  ;;  %v2774_v62 = vpop.f32.mrb[55].mxu1 }
 0x2a1   : > { %3381 = vst [vmem:[%s5552_s16 + $0x1a0] sm:$0xff] %v3873_v55  ;;  %v3875_v61 = vadd.f32 %v3315_v60, %v2772_v59  ;;  %v3317_v63 = vpop.f32.mrb[55].mxu0 }
 0x2a2   : > { %3382 = vst.msk [vmem:[%s5552_s16 + $0x1a8] sm:$0xff] %vm3329_vm1, %v3874_v58  ;;  %v3876_v0 = vadd.f32 %v3317_v63, %v2774_v62 }
 0x2a3   : > { %3383 = vst [vmem:[%s5552_s16 + $0x1b0] sm:$0xff] %v3875_v61 }
 0x2a4   : > { %3384 = vst.msk [vmem:[%s5552_s16 + $0x1b8] sm:$0xff] %vm3329_vm1, %v3876_v0 }
 0x2a5   : > { %v2778_v1 = vpop.f32.mrb[56].mxu1 }
 0x2a6   : > { %v3321_v2 = vpop.f32.mrb[56].mxu0  ;;  %v2780_v4 = vpop.f32.mrb[57].mxu1 }
 0x2a7   : > { %v3877_v3 = vadd.f32 %v3321_v2, %v2778_v1  ;;  %v3323_v5 = vpop.f32.mrb[57].mxu0  ;;  %v2782_v7 = vpop.f32.mrb[58].mxu1 }
 0x2a8   : > { %v3878_v6 = vadd.f32 %v3323_v5, %v2780_v4  ;;  %v3325_v8 = vpop.f32.mrb[58].mxu0  ;;  %v2783_v9 = vpop.f32.mrb[59].mxu1 }
 0x2a9   : > { %3385 = vst [vmem:[%s5552_s16 + $0x1c0] sm:$0xff] %v3877_v3  ;;  %v3326_v10 = vpop.f32.mrb[59].mxu0 }
 0x2aa   : > { %3386 = vst.msk [vmem:[%s5552_s16 + $0x1c8] sm:$0xff] %vm3329_vm1, %v3878_v6 }
 0x2ab PF: > { %p12_p8 = scmp.ge.s32.totalorder %s4766_s14, 8   ;;  %s5659_s9 = smov %s4717_s10 }
 0x2ac   : > { %s5660_s10 = smov %s4721_s11  ;;  %s5661_s11 = smov %s4776_s17 }
 0x2ad   : > { %s5662_s12 = smov %s4766_s14  ;;  %14 = sbr.rel (!%p12_p8) target bundleno = 3 (0x3), region = 68 }
 0x2b4   :  { %3411 = vsyncpa [#allocation3], 1 }
 0x2b5   :  { %3413 = vsyncpa [#allocation3 + $0x1], 1 }

</bundles_post_ra>
